<compile_context>
chip_gen: v7x
topology: tpu7x:2x2x1
jax: 0.10.0
libtpu: 0.0.40
codegen_flags: <defaults>
</compile_context>

<pallas_src>
import jax
import jax.numpy as jnp
from jax import lax
from jax.experimental import pallas as pl
from jax.experimental.pallas import tpu as pltpu

EPS = 1e-5
LANE = 128


def _round_up(x, m):
    return (x + m - 1) // m * m


def _pick_row_tile(m):
    """Largest divisor of m that is a multiple of 16 (then 8) and <= 1024."""
    for step in (16, 8):
        best = 0
        for t in range(step, min(m, 1024) + 1, step):
            if m % t == 0:
                best = t
        if best:
            return best
    return m


def _pick_band_rows(H, W):
    """Row-band height TH (TH | H) for the 3x3-conv pass: prefer >=2 bands
    (pipelining / megacore) with a band of <=~640 flattened rows."""
    divs = [t for t in range(1, H + 1) if H % t == 0]
    good = [t for t in divs if t >= 4 and t * W <= 640 and H // t >= 2]
    if good:
        return max(good)
    ok = [t for t in divs if t * W <= 1024]
    return max(ok) if ok else H


def _vmem_limit_bytes():
    """~half of physical VMEM: ~32 MiB on v7x (64 MiB phys), ~64 MiB on v5e/v6e."""
    try:
        phys = pltpu.get_tpu_info().vmem_capacity_bytes
    except Exception:  # any query failure -> conservative default
        phys = 64 * 1024 * 1024
    return int(min(max(phys // 2, 32 * 1024 * 1024), 96 * 1024 * 1024))


def _pad_last(a, to):
    if a.shape[-1] == to:
        return a
    cfg = [(0, 0)] * (a.ndim - 1) + [(0, to - a.shape[-1])]
    return jnp.pad(a, cfg)


# ---------------- Pallas kernels ----------------

def _partial_stats(y):
    # y: (rows, C) f32 -> per-tile (1, 1, C) sum and sum-of-squares partials.
    s = jnp.sum(y, axis=0, keepdims=True)[None]
    ss = jnp.sum(y * y, axis=0, keepdims=True)[None]
    return s, ss


def conv1_stats_kernel(x_ref, w_ref, y_ref, ssum_ref, ssq_ref):
    """1x1 conv as lane-dense matmul (bf16 MXU / f32 acc) + bn1 partial stats."""
    y = jnp.dot(x_ref[...], w_ref[...], preferred_element_type=jnp.float32)
    y_ref[...] = y.astype(y_ref.dtype)
    ssum_ref[...], ssq_ref[...] = _partial_stats(y)


def bn_relu_conv3x3_stats_kernel(x_ref, x_hbm, sc_ref, sh_ref, w_ref,
                                 y_ref, ssum_ref, ssq_ref,
                                 pad_ref, patches_ref, halo_ref, sem):
    """Apply bn1 (fused scale/shift) + relu, then 3x3 conv as ONE K=9C MXU
    matmul over a ROW BAND of one image (grid = (N, H // TH)).

    The one-row halos above / below the band are fetched with a manual DMA
    from the full tensor (passed again with memory_space=pl.ANY)."""
    TH, W, C = x_ref.shape
    n = pl.program_id(0)
    h = pl.program_id(1)
    n_bands = pl.num_programs(1)
    H = n_bands * TH

    # Kick off the 1-row halo fetches (rows just above / below this band).
    top = jnp.maximum(h * TH - 1, 0)
    bot = jnp.minimum(h * TH + TH, H - 1)
    cp_top = pltpu.make_async_copy(x_hbm.at[n, pl.ds(top, 1)],
                                   halo_ref.at[pl.ds(0, 1)], sem.at[0])
    cp_bot = pltpu.make_async_copy(x_hbm.at[n, pl.ds(bot, 1)],
                                   halo_ref.at[pl.ds(1, 1)], sem.at[1])
    cp_top.start()
    cp_bot.start()

    sc = sc_ref[...].reshape(1, 1, C)
    sh = sh_ref[...].reshape(1, 1, C)

    # Only pad columns 7 and W+8 are ever read by the taps -> zero just those
    # (halo rows and the band interior are fully overwritten every step, so no
    # first-step-only init; this stays correct under megacore splitting).
    zcol = jnp.zeros((TH + 2, 1, C), pad_ref.dtype)
    pad_ref[:, 7:8, :] = zcol
    pad_ref[:, W + 8:W + 9, :] = zcol

    # bn1 + relu on the band; write at sublane-aligned column offset 8.
    z = jnp.maximum(x_ref[...].astype(jnp.float32) * sc + sh, 0.0)
    pad_ref[1:TH + 1, 8:8 + W, :] = z.astype(pad_ref.dtype)

    # Halo rows (forced to zero at the image's true top / bottom edge).
    cp_top.wait()
    cp_bot.wait()
    halo = jnp.maximum(halo_ref[...].astype(jnp.float32) * sc + sh, 0.0)
    pad_ref[0:1, 8:8 + W, :] = jnp.where(h > 0, halo[0:1],
                                         0.0).astype(pad_ref.dtype)
    pad_ref[TH + 1:TH + 2, 8:8 + W, :] = jnp.where(h < n_bands - 1, halo[1:2],
                                                   0.0).astype(pad_ref.dtype)

    # im2col: write the 9 shifted taps straight into the patches scratch
    # (no concatenate -> no double materialization), then ONE K=9C matmul.
    for t in range(9):
        dh, dw = divmod(t, 3)
        tap = pad_ref[dh:dh + TH, 7 + dw:7 + dw + W, :]
        patches_ref[:, t * C:(t + 1) * C] = tap.reshape(TH * W, C)

    y = jnp.dot(patches_ref[...], w_ref[...], preferred_element_type=jnp.float32)
    y_ref[...] = y.reshape(TH, W, C).astype(y_ref.dtype)
    ssum_ref[...], ssq_ref[...] = _partial_stats(y)


def bn_relu_conv1_stats_kernel(x_ref, sc_ref, sh_ref, w_ref,
                               y_ref, ssum_ref, ssq_ref):
    """Apply bn2 + relu, 1x1 conv as matmul, bn3 partial stats."""
    z = jnp.maximum(x_ref[...].astype(jnp.float32) * sc_ref[...] + sh_ref[...],
                    0.0)
    y = jnp.dot(z.astype(jnp.bfloat16), w_ref[...],
                preferred_element_type=jnp.float32)
    y_ref[...] = y.astype(y_ref.dtype)
    ssum_ref[...], ssq_ref[...] = _partial_stats(y)


def bn_add_relu_kernel(y_ref, sc_ref, sh_ref, res_ref, o_ref):
    """Apply bn3 (scale/shift) + residual add + relu (bf16 in / bf16 out)."""
    y = y_ref[...].astype(jnp.float32) * sc_ref[...] + sh_ref[...]
    o_ref[...] = jnp.maximum(y + res_ref[...].astype(jnp.float32),
                             0.0).astype(o_ref.dtype)


# ---------------- wrapper ----------------

def _bn_scale_shift(sum_parts, sq_parts, gamma, beta, count):
    """Fold BatchNorm (batch stats, biased var) into per-channel scale/shift."""
    s = jnp.sum(sum_parts, axis=(0, 1))
    ss = jnp.sum(sq_parts, axis=(0, 1))
    mean = s / count
    var = jnp.maximum(ss / count - mean * mean, 0.0)
    scale = gamma * lax.rsqrt(var + EPS)
    shift = beta - mean * scale
    return scale.reshape(1, -1), shift.reshape(1, -1)


def bottleneck_forward(x_nchw, params):
    (w1, g1, b1, w2, g2, b2, w3, g3, b3) = params
    N, Cin, H, W = x_nchw.shape
    P = w1.shape[1]          # planes
    Cout = w3.shape[1]       # planes * 4 (== Cin, identity residual)
    assert Cout == Cin, "downsample=None requires inplanes == planes * expansion"

    Cin_p = _round_up(Cin, LANE)
    P_p = _round_up(P, LANE)
    Cout_p = _round_up(Cout, LANE)
    assert Cin_p == Cout_p

    M = N * H * W
    TM = _pick_row_tile(M)
    n_tiles = M // TM
    TH = _pick_band_rows(H, W)
    n_bands = H // TH

    vmem_limit = _vmem_limit_bytes()
    row_params = pltpu.CompilerParams(
        dimension_semantics=("parallel",), vmem_limit_bytes=vmem_limit)
    band_params = pltpu.CompilerParams(
        dimension_semantics=("parallel", "parallel"), vmem_limit_bytes=vmem_limit)

    # NCHW -> NHWC (channels on the lane axis), padded to a multiple of 128,
    # stored bf16 (input and residual -> less HBM traffic on passes A and D).
    x_nhwc = jnp.transpose(x_nchw, (0, 2, 3, 1))
    x2d = _pad_last(x_nhwc.reshape(M, Cin), Cin_p).astype(jnp.bfloat16)

    # Channel-padded weights (bf16 MXU operands) and BN affine params.
    w1_p = jnp.pad(w1, ((0, Cin_p - Cin), (0, P_p - P))).astype(jnp.bfloat16)
    w2_p = jnp.pad(w2, ((0, 0), (0, 0), (0, P_p - P), (0, P_p - P)))
    w2_packed = w2_p.reshape(9 * P_p, P_p).astype(jnp.bfloat16)    # taps on K axis
    w3_p = jnp.pad(w3, ((0, P_p - P), (0, Cout_p - Cout))).astype(jnp.bfloat16)
    g1_p, b1_p = jnp.pad(g1, (0, P_p - P)), jnp.pad(b1, (0, P_p - P))
    g2_p, b2_p = jnp.pad(g2, (0, P_p - P)), jnp.pad(b2, (0, P_p - P))
    g3_p, b3_p = jnp.pad(g3, (0, Cout_p - Cout)), jnp.pad(b3, (0, Cout_p - Cout))

    # ---- pass A: conv1 + bn1 partial stats (grid over row tiles) ----
    y1, s1, q1 = pl.pallas_call(
        conv1_stats_kernel,
        out_shape=(jax.ShapeDtypeStruct((M, P_p), jnp.bfloat16),
                   jax.ShapeDtypeStruct((n_tiles, 1, P_p), jnp.float32),
                   jax.ShapeDtypeStruct((n_tiles, 1, P_p), jnp.float32)),
        grid=(n_tiles,),
        in_specs=[pl.BlockSpec((TM, Cin_p), lambda i: (i, 0)),
                  pl.BlockSpec((Cin_p, P_p), lambda i: (0, 0))],
        out_specs=(pl.BlockSpec((TM, P_p), lambda i: (i, 0)),
                   pl.BlockSpec((1, 1, P_p), lambda i: (i, 0, 0)),
                   pl.BlockSpec((1, 1, P_p), lambda i: (i, 0, 0))),
        compiler_params=row_params,
    )(x2d, w1_p)
    sc1, sh1 = _bn_scale_shift(s1, q1, g1_p, b1_p, M)

    # ---- pass B: bn1+relu -> 3x3 conv (row-band tiled, K=9C) + bn2 stats ----
    y1_4d = y1.reshape(N, H, W, P_p)
    y2, s2, q2 = pl.pallas_call(
        bn_relu_conv3x3_stats_kernel,
        out_shape=(jax.ShapeDtypeStruct((N, H, W, P_p), jnp.bfloat16),
                   jax.ShapeDtypeStruct((N * n_bands, 1, P_p), jnp.float32),
                   jax.ShapeDtypeStruct((N * n_bands, 1, P_p), jnp.float32)),
        grid=(N, n_bands),
        in_specs=[pl.BlockSpec((None, TH, W, P_p), lambda n, h: (n, h, 0, 0)),
                  pl.BlockSpec(memory_space=pl.ANY),      # same tensor, for halo DMA
                  pl.BlockSpec((1, P_p), lambda n, h: (0, 0)),
                  pl.BlockSpec((1, P_p), lambda n, h: (0, 0)),
                  pl.BlockSpec((9 * P_p, P_p), lambda n, h: (0, 0))],
        out_specs=(pl.BlockSpec((None, TH, W, P_p), lambda n, h: (n, h, 0, 0)),
                   pl.BlockSpec((1, 1, P_p),
                                lambda n, h: (n * n_bands + h, 0, 0)),
                   pl.BlockSpec((1, 1, P_p),
                                lambda n, h: (n * n_bands + h, 0, 0))),
        scratch_shapes=[pltpu.VMEM((TH + 2, W + 16, P_p), jnp.bfloat16),
                        pltpu.VMEM((TH * W, 9 * P_p), jnp.bfloat16),
                        pltpu.VMEM((2, W, P_p), jnp.bfloat16),
                        pltpu.SemaphoreType.DMA((2,))],
        compiler_params=band_params,
    )(y1_4d, y1_4d, sc1, sh1, w2_packed)
    sc2, sh2 = _bn_scale_shift(s2, q2, g2_p, b2_p, M)

    # ---- pass C: bn2+relu -> conv3 (1x1 matmul) + bn3 stats ----
    y2_2d = y2.reshape(M, P_p)
    y3, s3, q3 = pl.pallas_call(
        bn_relu_conv1_stats_kernel,
        out_shape=(jax.ShapeDtypeStruct((M, Cout_p), jnp.bfloat16),
                   jax.ShapeDtypeStruct((n_tiles, 1, Cout_p), jnp.float32),
                   jax.ShapeDtypeStruct((n_tiles, 1, Cout_p), jnp.float32)),
        grid=(n_tiles,),
        in_specs=[pl.BlockSpec((TM, P_p), lambda i: (i, 0)),
                  pl.BlockSpec((1, P_p), lambda i: (0, 0)),
                  pl.BlockSpec((1, P_p), lambda i: (0, 0)),
                  pl.BlockSpec((P_p, Cout_p), lambda i: (0, 0))],
        out_specs=(pl.BlockSpec((TM, Cout_p), lambda i: (i, 0)),
                   pl.BlockSpec((1, 1, Cout_p), lambda i: (i, 0, 0)),
                   pl.BlockSpec((1, 1, Cout_p), lambda i: (i, 0, 0))),
        compiler_params=row_params,
    )(y2_2d, sc2, sh2, w3_p)
    sc3, sh3 = _bn_scale_shift(s3, q3, g3_p, b3_p, M)

    # ---- pass D: bn3 + residual add + relu (bf16 out aliased onto x2d) ----
    out2d = pl.pallas_call(
        bn_add_relu_kernel,
        out_shape=jax.ShapeDtypeStruct((M, Cout_p), jnp.bfloat16),
        grid=(n_tiles,),
        in_specs=[pl.BlockSpec((TM, Cout_p), lambda i: (i, 0)),
                  pl.BlockSpec((1, Cout_p), lambda i: (0, 0)),
                  pl.BlockSpec((1, Cout_p), lambda i: (0, 0)),
                  pl.BlockSpec((TM, Cout_p), lambda i: (i, 0))],
        out_specs=pl.BlockSpec((TM, Cout_p), lambda i: (i, 0)),
        input_output_aliases={3: 0},
        compiler_params=row_params,
    )(y3, sc3, sh3, x2d)

    out = out2d[:, :Cout].astype(jnp.float32).reshape(N, H, W, Cout)
    return jnp.transpose(out, (0, 3, 1, 2))  # back to NCHW


# ---------------- pure-JAX reference (for correctness check) ----------------

def bottleneck_reference(x_nchw, params):
    (w1, g1, b1, w2, g2, b2, w3, g3, b3) = params
    x = jnp.transpose(x_nchw, (0, 2, 3, 1)).astype(jnp.float32)

    def bn(y, g, b):
        mean = jnp.mean(y, axis=(0, 1, 2), keepdims=True)
        var = jnp.mean((y - mean) ** 2, axis=(0, 1, 2), keepdims=True)
        return (y - mean) * lax.rsqrt(var + EPS) * g + b

    y = jnp.einsum("nhwc,co->nhwo", x, w1)
    y = jax.nn.relu(bn(y, g1, b1))
    y = lax.conv_general_dilated(
        y, w2, window_strides=(1, 1), padding="SAME",
        dimension_numbers=("NHWC", "HWIO", "NHWC"))
    y = jax.nn.relu(bn(y, g2, b2))
    y = jnp.einsum("nhwc,co->nhwo", y, w3)
    y = jax.nn.relu(bn(y, g3, b3) + x)
    return jnp.transpose(y, (0, 3, 1, 2))


if __name__ == "__main__":
    # Small shapes: batch=2, inplanes=16, planes=4 (expansion=4 -> out 16), 8x8.
    # H=8 -> TH=4, n_bands=2, so the halo-DMA row-band path is exercised.
    N, Cin, H, W = 2, 16, 8, 8
    P = 4

    key = jax.random.PRNGKey(0)
    kx, k1, k2, k3, kg, kb = jax.random.split(key, 6)
    x = jax.random.normal(kx, (N, Cin, H, W), jnp.float32)

    w1 = jax.random.normal(k1, (Cin, P), jnp.float32) * 0.1       # conv1: 1x1
    w2 = jax.random.normal(k2, (3, 3, P, P), jnp.float32) * 0.1   # conv2: 3x3 HWIO
    w3 = jax.random.normal(k3, (P, 4 * P), jnp.float32) * 0.1     # conv3: 1x1
    gs = 1.0 + 0.1 * jax.random.normal(kg, (P + P + 4 * P,), jnp.float32)
    bs = 0.1 * jax.random.normal(kb, (P + P + 4 * P,), jnp.float32)
    g1, g2, g3 = gs[:P], gs[P:2 * P], gs[2 * P:]
    b1, b2, b3 = bs[:P], bs[P:2 * P], bs[2 * P:]
    params = (w1, g1, b1, w2, g2, b2, w3, g3, b3)

    out = jax.block_until_ready(jax.jit(bottleneck_forward)(x, params))
    ref = jax.block_until_ready(bottleneck_reference(x, params))

    assert out.shape == (N, Cin, H, W), out.shape
    # bf16 storage of input / intermediates + bf16 MXU -> loose-ish tolerance.
    err = float(jnp.max(jnp.abs(out - ref)))
    assert jnp.allclose(out, ref, rtol=4e-2, atol=4e-2), err

    print("KERNEL_OK")
</pallas_src>

<mosaic_0001>
module attributes {stable_mosaic.version = 11 : i64} {
  func.func @conv1_stats_kernel(%arg0: i32, %arg1: memref<128x128xbf16, #tpu.memory_space<vmem>>, %arg2: memref<128x128xbf16, #tpu.memory_space<vmem>>, %arg3: memref<128x128xbf16, #tpu.memory_space<vmem>>, %arg4: memref<1x1x128xf32, #tpu.memory_space<vmem>>, %arg5: memref<1x1x128xf32, #tpu.memory_space<vmem>>) attributes {dimension_semantics = [#tpu.dimension_semantics<parallel>], iteration_bounds = array<i64: 1>, scalar_prefetch = 0 : i64, scratch_operands = 0 : i64, tpu.core_type = #tpu.core_type<tc>, window_params = [{transform_indices = @transform_0, window_bounds = array<i64: 128, 128>}, {pipeline_mode = #tpu.pipeline_mode<synchronous>, transform_indices = @transform_1, window_bounds = array<i64: 128, 128>}, {transform_indices = @transform_2, window_bounds = array<i64: 128, 128>}, {transform_indices = @transform_3, window_bounds = array<i64: 1, 1, 128>}, {transform_indices = @transform_4, window_bounds = array<i64: 1, 1, 128>}]} {
    %c0 = arith.constant 0 : index
    %c0_0 = arith.constant 0 : index
    %0 = vector.load %arg1[%c0, %c0_0] : memref<128x128xbf16, #tpu.memory_space<vmem>>, vector<128x128xbf16>
    %c0_1 = arith.constant 0 : index
    %c0_2 = arith.constant 0 : index
    %1 = vector.load %arg2[%c0_1, %c0_2] : memref<128x128xbf16, #tpu.memory_space<vmem>>, vector<128x128xbf16>
    %cst = arith.constant dense<0.000000e+00> : vector<128x128xf32>
    %2 = tpu.matmul %0, %1, %cst {dimension_numbers = #tpu.dot_dimension_numbers<[1], [0], [0], [1], [0, 0, 1, 1], [], []>} : vector<128x128xbf16>, vector<128x128xbf16>, vector<128x128xf32> -> vector<128x128xf32>
    %3 = arith.truncf %2 : vector<128x128xf32> to vector<128x128xbf16>
    %c0_3 = arith.constant 0 : index
    %c0_4 = arith.constant 0 : index
    %4 = vector.load %arg3[%c0_3, %c0_4] : memref<128x128xbf16, #tpu.memory_space<vmem>>, vector<128x128xbf16>
    tpu.vector_store %arg3[%c0_3, %c0_4], %3 {strides = array<i32>} : memref<128x128xbf16, #tpu.memory_space<vmem>>, vector<128x128xbf16>,
    %cst_5 = arith.constant dense<0.000000e+00> : vector<128xf32>
    %5 = vector.multi_reduction <add>, %2, %cst_5 [0] : vector<128x128xf32> to vector<128xf32>
    %6 = vector.shape_cast %5 : vector<128xf32> to vector<1x128xf32>
    %7 = vector.shape_cast %6 : vector<1x128xf32> to vector<1x1x128xf32>
    %8 = arith.mulf %2, %2 : vector<128x128xf32>
    %cst_6 = arith.constant dense<0.000000e+00> : vector<128xf32>
    %9 = vector.multi_reduction <add>, %8, %cst_6 [0] : vector<128x128xf32> to vector<128xf32>
    %10 = vector.shape_cast %9 : vector<128xf32> to vector<1x128xf32>
    %11 = vector.shape_cast %10 : vector<1x128xf32> to vector<1x1x128xf32>
    %c0_7 = arith.constant 0 : index
    %c0_8 = arith.constant 0 : index
    %c0_9 = arith.constant 0 : index
    %12 = vector.load %arg4[%c0_7, %c0_8, %c0_9] : memref<1x1x128xf32, #tpu.memory_space<vmem>>, vector<1x1x128xf32>
    tpu.vector_store %arg4[%c0_7, %c0_8, %c0_9], %7 {strides = array<i32>} : memref<1x1x128xf32, #tpu.memory_space<vmem>>, vector<1x1x128xf32>,
    %c0_10 = arith.constant 0 : index
    %c0_11 = arith.constant 0 : index
    %c0_12 = arith.constant 0 : index
    %13 = vector.load %arg5[%c0_10, %c0_11, %c0_12] : memref<1x1x128xf32, #tpu.memory_space<vmem>>, vector<1x1x128xf32>
    tpu.vector_store %arg5[%c0_10, %c0_11, %c0_12], %11 {strides = array<i32>} : memref<1x1x128xf32, #tpu.memory_space<vmem>>, vector<1x1x128xf32>,
    return
  }
  func.func @transform_0(%arg0: i32) -> (i32, i32) {
    %c0_i32 = arith.constant 0 : i32
    %c0_i32_0 = arith.constant 0 : i32
    return %arg0, %c0_i32 : i32, i32
  }
  func.func @transform_1(%arg0: i32) -> (i32, i32) {
    %c0_i32 = arith.constant 0 : i32
    %c0_i32_0 = arith.constant 0 : i32
    %c0_i32_1 = arith.constant 0 : i32
    return %c0_i32, %c0_i32_0 : i32, i32
  }
  func.func @transform_2(%arg0: i32) -> (i32, i32) {
    %c0_i32 = arith.constant 0 : i32
    %c0_i32_0 = arith.constant 0 : i32
    return %arg0, %c0_i32 : i32, i32
  }
  func.func @transform_3(%arg0: i32) -> (i32, i32, i32) {
    %c0_i32 = arith.constant 0 : i32
    %c0_i32_0 = arith.constant 0 : i32
    %c0_i32_1 = arith.constant 0 : i32
    return %arg0, %c0_i32, %c0_i32_0 : i32, i32, i32
  }
  func.func @transform_4(%arg0: i32) -> (i32, i32, i32) {
    %c0_i32 = arith.constant 0 : i32
    %c0_i32_0 = arith.constant 0 : i32
    %c0_i32_1 = arith.constant 0 : i32
    return %arg0, %c0_i32, %c0_i32_0 : i32, i32, i32
  }
}

module attributes {stable_mosaic.version = 11 : i64} {
  func.func @bn_relu_conv3x3_stats_kernel(%arg0: i32, %arg1: i32, %arg2: memref<1x4x8x128xbf16, #tpu.memory_space<vmem>>, %arg3: memref<2x8x8x128xbf16, #tpu.memory_space<any>>, %arg4: memref<1x128xf32, #tpu.memory_space<vmem>>, %arg5: memref<1x128xf32, #tpu.memory_space<vmem>>, %arg6: memref<1152x128xbf16, #tpu.memory_space<vmem>>, %arg7: memref<1x4x8x128xbf16, #tpu.memory_space<vmem>>, %arg8: memref<1x1x128xf32, #tpu.memory_space<vmem>>, %arg9: memref<1x1x128xf32, #tpu.memory_space<vmem>>, %arg10: memref<6x24x128xbf16, #tpu.memory_space<vmem>>, %arg11: memref<32x1152xbf16, #tpu.memory_space<vmem>>, %arg12: memref<2x8x128xbf16, #tpu.memory_space<vmem>>, %arg13: memref<2x!tpu.dma_semaphore, #tpu.memory_space<semaphore_mem>>) attributes {dimension_semantics = [#tpu.dimension_semantics<parallel>, #tpu.dimension_semantics<parallel>], iteration_bounds = array<i64: 2, 2>, scalar_prefetch = 0 : i64, scratch_operands = 4 : i64, tpu.core_type = #tpu.core_type<tc>, window_params = [{transform_indices = @transform_0, window_bounds = array<i64: 1, 4, 8, 128>}, {}, {pipeline_mode = #tpu.pipeline_mode<synchronous>, transform_indices = @transform_2, window_bounds = array<i64: 1, 128>}, {pipeline_mode = #tpu.pipeline_mode<synchronous>, transform_indices = @transform_3, window_bounds = array<i64: 1, 128>}, {pipeline_mode = #tpu.pipeline_mode<synchronous>, transform_indices = @transform_4, window_bounds = array<i64: 1152, 128>}, {transform_indices = @transform_5, window_bounds = array<i64: 1, 4, 8, 128>}, {transform_indices = @transform_6, window_bounds = array<i64: 1, 1, 128>}, {transform_indices = @transform_7, window_bounds = array<i64: 1, 1, 128>}]} {
    %c4_i32 = arith.constant 4 : i32
    %0 = arith.muli %arg1, %c4_i32 : i32
    %c1_i32 = arith.constant 1 : i32
    %1 = arith.subi %0, %c1_i32 : i32
    %c0_i32 = arith.constant 0 : i32
    %2 = arith.maxsi %1, %c0_i32 : i32
    %c4_i32_0 = arith.constant 4 : i32
    %3 = arith.muli %arg1, %c4_i32_0 : i32
    %c4_i32_1 = arith.constant 4 : i32
    %4 = arith.addi %3, %c4_i32_1 : i32
    %c7_i32 = arith.constant 7 : i32
    %5 = arith.minsi %4, %c7_i32 : i32
    %c0_i32_2 = arith.constant 0 : i32
    %c0_i32_3 = arith.constant 0 : i32
    %c0_i32_4 = arith.constant 0 : i32
    %6 = tpu.memref_slice %arg3[%arg0, %2, %c0_i32_3, %c0_i32_4] : memref<2x8x8x128xbf16, #tpu.memory_space<any>> -> memref<1x1x8x128xbf16, #tpu.memory_space<any>>
    %7 = tpu.memref_squeeze %6 : memref<1x1x8x128xbf16, #tpu.memory_space<any>> -> memref<1x8x128xbf16, #tpu.memory_space<any>>
    %c0_i32_5 = arith.constant 0 : i32
    %c0_i32_6 = arith.constant 0 : i32
    %c0_i32_7 = arith.constant 0 : i32
    %8 = tpu.memref_slice %arg12[%c0_i32_5, %c0_i32_6, %c0_i32_7] : memref<2x8x128xbf16, #tpu.memory_space<vmem>> -> memref<1x8x128xbf16, #tpu.memory_space<vmem>>
    %9 = tpu.memref_slice %arg13[%c0_i32_2] : memref<2x!tpu.dma_semaphore, #tpu.memory_space<semaphore_mem>> -> memref<1x!tpu.dma_semaphore, #tpu.memory_space<semaphore_mem>>
    %10 = tpu.memref_squeeze %9 : memref<1x!tpu.dma_semaphore, #tpu.memory_space<semaphore_mem>> -> memref<!tpu.dma_semaphore, #tpu.memory_space<semaphore_mem>>
    tpu.enqueue_dma source(%7 : memref<1x8x128xbf16, #tpu.memory_space<any>>) target(%8 : memref<1x8x128xbf16, #tpu.memory_space<vmem>>) target_semaphore(%10 : memref<!tpu.dma_semaphore, #tpu.memory_space<semaphore_mem>>)
    %c1_i32_8 = arith.constant 1 : i32
    %c0_i32_9 = arith.constant 0 : i32
    %c0_i32_10 = arith.constant 0 : i32
    %11 = tpu.memref_slice %arg3[%arg0, %5, %c0_i32_9, %c0_i32_10] : memref<2x8x8x128xbf16, #tpu.memory_space<any>> -> memref<1x1x8x128xbf16, #tpu.memory_space<any>>
    %12 = tpu.memref_squeeze %11 : memref<1x1x8x128xbf16, #tpu.memory_space<any>> -> memref<1x8x128xbf16, #tpu.memory_space<any>>
    %c1_i32_11 = arith.constant 1 : i32
    %c0_i32_12 = arith.constant 0 : i32
    %c0_i32_13 = arith.constant 0 : i32
    %13 = tpu.memref_slice %arg12[%c1_i32_11, %c0_i32_12, %c0_i32_13] : memref<2x8x128xbf16, #tpu.memory_space<vmem>> -> memref<1x8x128xbf16, #tpu.memory_space<vmem>>
    %14 = tpu.memref_slice %arg13[%c1_i32_8] : memref<2x!tpu.dma_semaphore, #tpu.memory_space<semaphore_mem>> -> memref<1x!tpu.dma_semaphore, #tpu.memory_space<semaphore_mem>>
    %15 = tpu.memref_squeeze %14 : memref<1x!tpu.dma_semaphore, #tpu.memory_space<semaphore_mem>> -> memref<!tpu.dma_semaphore, #tpu.memory_space<semaphore_mem>>
    tpu.enqueue_dma source(%12 : memref<1x8x128xbf16, #tpu.memory_space<any>>) target(%13 : memref<1x8x128xbf16, #tpu.memory_space<vmem>>) target_semaphore(%15 : memref<!tpu.dma_semaphore, #tpu.memory_space<semaphore_mem>>)
    %c0 = arith.constant 0 : index
    %c0_14 = arith.constant 0 : index
    %16 = vector.load %arg4[%c0, %c0_14] : memref<1x128xf32, #tpu.memory_space<vmem>>, vector<1x128xf32>
    %17 = vector.shape_cast %16 : vector<1x128xf32> to vector<1x1x128xf32>
    %c0_15 = arith.constant 0 : index
    %c0_16 = arith.constant 0 : index
    %18 = vector.load %arg5[%c0_15, %c0_16] : memref<1x128xf32, #tpu.memory_space<vmem>>, vector<1x128xf32>
    %19 = vector.shape_cast %18 : vector<1x128xf32> to vector<1x1x128xf32>
    %cst = arith.constant 0.000000e+00 : bf16
    %20 = vector.broadcast %cst : bf16 to vector<6x1x128xbf16>
    %c0_17 = arith.constant 0 : index
    %c7 = arith.constant 7 : index
    %c0_18 = arith.constant 0 : index
    %21 = vector.load %arg10[%c0_17, %c7, %c0_18] : memref<6x24x128xbf16, #tpu.memory_space<vmem>>, vector<6x1x128xbf16>
    tpu.vector_store %arg10[%c0_17, %c7, %c0_18], %20 {strides = array<i32>} : memref<6x24x128xbf16, #tpu.memory_space<vmem>>, vector<6x1x128xbf16>,
    %c0_19 = arith.constant 0 : index
    %c16 = arith.constant 16 : index
    %c0_20 = arith.constant 0 : index
    %22 = vector.load %arg10[%c0_19, %c16, %c0_20] : memref<6x24x128xbf16, #tpu.memory_space<vmem>>, vector<6x1x128xbf16>
    tpu.vector_store %arg10[%c0_19, %c16, %c0_20], %20 {strides = array<i32>} : memref<6x24x128xbf16, #tpu.memory_space<vmem>>, vector<6x1x128xbf16>,
    %c0_21 = arith.constant 0 : index
    %c0_22 = arith.constant 0 : index
    %c0_23 = arith.constant 0 : index
    %c0_24 = arith.constant 0 : index
    %23 = vector.load %arg2[%c0_21, %c0_22, %c0_23, %c0_24] : memref<1x4x8x128xbf16, #tpu.memory_space<vmem>>, vector<1x4x8x128xbf16>
    %24 = vector.shape_cast %23 : vector<1x4x8x128xbf16> to vector<4x8x128xbf16>
    %25 = arith.extf %24 : vector<4x8x128xbf16> to vector<4x8x128xf32>
    %26 = vector.broadcast %17 : vector<1x1x128xf32> to vector<4x8x128xf32>
    %27 = arith.mulf %25, %26 : vector<4x8x128xf32>
    %28 = vector.broadcast %19 : vector<1x1x128xf32> to vector<4x8x128xf32>
    %29 = arith.addf %27, %28 : vector<4x8x128xf32>
    %cst_25 = arith.constant 0.000000e+00 : f32
    %30 = vector.broadcast %cst_25 : f32 to vector<4x8x128xf32>
    %31 = arith.maximumf %29, %30 : vector<4x8x128xf32>
    %32 = arith.truncf %31 : vector<4x8x128xf32> to vector<4x8x128xbf16>
    %c1 = arith.constant 1 : index
    %c8 = arith.constant 8 : index
    %c0_26 = arith.constant 0 : index
    %33 = vector.load %arg10[%c1, %c8, %c0_26] : memref<6x24x128xbf16, #tpu.memory_space<vmem>>, vector<4x8x128xbf16>
    tpu.vector_store %arg10[%c1, %c8, %c0_26], %32 {strides = array<i32>} : memref<6x24x128xbf16, #tpu.memory_space<vmem>>, vector<4x8x128xbf16>,
    %c0_i32_27 = arith.constant 0 : i32
    %c0_i32_28 = arith.constant 0 : i32
    %c0_i32_29 = arith.constant 0 : i32
    %34 = tpu.memref_slice %arg3[%arg0, %2, %c0_i32_28, %c0_i32_29] : memref<2x8x8x128xbf16, #tpu.memory_space<any>> -> memref<1x1x8x128xbf16, #tpu.memory_space<any>>
    %35 = tpu.memref_squeeze %34 : memref<1x1x8x128xbf16, #tpu.memory_space<any>> -> memref<1x8x128xbf16, #tpu.memory_space<any>>
    %c0_i32_30 = arith.constant 0 : i32
    %c0_i32_31 = arith.constant 0 : i32
    %c0_i32_32 = arith.constant 0 : i32
    %36 = tpu.memref_slice %arg12[%c0_i32_30, %c0_i32_31, %c0_i32_32] : memref<2x8x128xbf16, #tpu.memory_space<vmem>> -> memref<1x8x128xbf16, #tpu.memory_space<vmem>>
    %37 = tpu.memref_slice %arg13[%c0_i32_27] : memref<2x!tpu.dma_semaphore, #tpu.memory_space<semaphore_mem>> -> memref<1x!tpu.dma_semaphore, #tpu.memory_space<semaphore_mem>>
    %38 = tpu.memref_squeeze %37 : memref<1x!tpu.dma_semaphore, #tpu.memory_space<semaphore_mem>> -> memref<!tpu.dma_semaphore, #tpu.memory_space<semaphore_mem>>
    tpu.wait_dma2 semaphore(%38 : memref<!tpu.dma_semaphore, #tpu.memory_space<semaphore_mem>>) src(%35 : memref<1x8x128xbf16, #tpu.memory_space<any>>) dst(%36 : memref<1x8x128xbf16, #tpu.memory_space<vmem>>)
    %c1_i32_33 = arith.constant 1 : i32
    %c0_i32_34 = arith.constant 0 : i32
    %c0_i32_35 = arith.constant 0 : i32
    %39 = tpu.memref_slice %arg3[%arg0, %5, %c0_i32_34, %c0_i32_35] : memref<2x8x8x128xbf16, #tpu.memory_space<any>> -> memref<1x1x8x128xbf16, #tpu.memory_space<any>>
    %40 = tpu.memref_squeeze %39 : memref<1x1x8x128xbf16, #tpu.memory_space<any>> -> memref<1x8x128xbf16, #tpu.memory_space<any>>
    %c1_i32_36 = arith.constant 1 : i32
    %c0_i32_37 = arith.constant 0 : i32
    %c0_i32_38 = arith.constant 0 : i32
    %41 = tpu.memref_slice %arg12[%c1_i32_36, %c0_i32_37, %c0_i32_38] : memref<2x8x128xbf16, #tpu.memory_space<vmem>> -> memref<1x8x128xbf16, #tpu.memory_space<vmem>>
    %42 = tpu.memref_slice %arg13[%c1_i32_33] : memref<2x!tpu.dma_semaphore, #tpu.memory_space<semaphore_mem>> -> memref<1x!tpu.dma_semaphore, #tpu.memory_space<semaphore_mem>>
    %43 = tpu.memref_squeeze %42 : memref<1x!tpu.dma_semaphore, #tpu.memory_space<semaphore_mem>> -> memref<!tpu.dma_semaphore, #tpu.memory_space<semaphore_mem>>
    tpu.wait_dma2 semaphore(%43 : memref<!tpu.dma_semaphore, #tpu.memory_space<semaphore_mem>>) src(%40 : memref<1x8x128xbf16, #tpu.memory_space<any>>) dst(%41 : memref<1x8x128xbf16, #tpu.memory_space<vmem>>)
    %c0_39 = arith.constant 0 : index
    %c0_40 = arith.constant 0 : index
    %c0_41 = arith.constant 0 : index
    %44 = vector.load %arg12[%c0_39, %c0_40, %c0_41] : memref<2x8x128xbf16, #tpu.memory_space<vmem>>, vector<2x8x128xbf16>
    %45 = arith.extf %44 : vector<2x8x128xbf16> to vector<2x8x128xf32>
    %46 = vector.broadcast %17 : vector<1x1x128xf32> to vector<2x8x128xf32>
    %47 = arith.mulf %45, %46 : vector<2x8x128xf32>
    %48 = vector.broadcast %19 : vector<1x1x128xf32> to vector<2x8x128xf32>
    %49 = arith.addf %47, %48 : vector<2x8x128xf32>
    %cst_42 = arith.constant 0.000000e+00 : f32
    %50 = vector.broadcast %cst_42 : f32 to vector<2x8x128xf32>
    %51 = arith.maximumf %49, %50 : vector<2x8x128xf32>
    %c0_i32_43 = arith.constant 0 : i32
    %52 = arith.cmpi sgt, %arg1, %c0_i32_43 : i32
    %53 = vector.extract_strided_slice %51 {offsets = [0, 0, 0], sizes = [1, 8, 128], strides = [1, 1, 1]} : vector<2x8x128xf32> to vector<1x8x128xf32>
    %cst_44 = arith.constant 0.000000e+00 : f32
    %54 = vector.broadcast %cst_44 : f32 to vector<1x8x128xf32>
    %55 = arith.select %52, %53, %54 : vector<1x8x128xf32>
    %56 = arith.truncf %55 : vector<1x8x128xf32> to vector<1x8x128xbf16>
    %c0_45 = arith.constant 0 : index
    %c8_46 = arith.constant 8 : index
    %c0_47 = arith.constant 0 : index
    %57 = vector.load %arg10[%c0_45, %c8_46, %c0_47] : memref<6x24x128xbf16, #tpu.memory_space<vmem>>, vector<1x8x128xbf16>
    tpu.vector_store %arg10[%c0_45, %c8_46, %c0_47], %56 {strides = array<i32>} : memref<6x24x128xbf16, #tpu.memory_space<vmem>>, vector<1x8x128xbf16>,
    %c1_i32_48 = arith.constant 1 : i32
    %58 = arith.cmpi slt, %arg1, %c1_i32_48 : i32
    %59 = vector.extract_strided_slice %51 {offsets = [1, 0, 0], sizes = [1, 8, 128], strides = [1, 1, 1]} : vector<2x8x128xf32> to vector<1x8x128xf32>
    %cst_49 = arith.constant 0.000000e+00 : f32
    %60 = vector.broadcast %cst_49 : f32 to vector<1x8x128xf32>
    %61 = arith.select %58, %59, %60 : vector<1x8x128xf32>
    %62 = arith.truncf %61 : vector<1x8x128xf32> to vector<1x8x128xbf16>
    %c5 = arith.constant 5 : index
    %c8_50 = arith.constant 8 : index
    %c0_51 = arith.constant 0 : index
    %63 = vector.load %arg10[%c5, %c8_50, %c0_51] : memref<6x24x128xbf16, #tpu.memory_space<vmem>>, vector<1x8x128xbf16>
    tpu.vector_store %arg10[%c5, %c8_50, %c0_51], %62 {strides = array<i32>} : memref<6x24x128xbf16, #tpu.memory_space<vmem>>, vector<1x8x128xbf16>,
    %c0_52 = arith.constant 0 : index
    %c7_53 = arith.constant 7 : index
    %c0_54 = arith.constant 0 : index
    %64 = vector.load %arg10[%c0_52, %c7_53, %c0_54] : memref<6x24x128xbf16, #tpu.memory_space<vmem>>, vector<4x8x128xbf16>
    %65 = vector.shape_cast %64 : vector<4x8x128xbf16> to vector<32x128xbf16>
    %c0_55 = arith.constant 0 : index
    %c0_56 = arith.constant 0 : index
    %66 = vector.load %arg11[%c0_55, %c0_56] : memref<32x1152xbf16, #tpu.memory_space<vmem>>, vector<32x128xbf16>
    tpu.vector_store %arg11[%c0_55, %c0_56], %65 {strides = array<i32>} : memref<32x1152xbf16, #tpu.memory_space<vmem>>, vector<32x128xbf16>,
    %c0_57 = arith.constant 0 : index
    %c8_58 = arith.constant 8 : index
    %c0_59 = arith.constant 0 : index
    %67 = vector.load %arg10[%c0_57, %c8_58, %c0_59] : memref<6x24x128xbf16, #tpu.memory_space<vmem>>, vector<4x8x128xbf16>
    %68 = vector.shape_cast %67 : vector<4x8x128xbf16> to vector<32x128xbf16>
    %c0_60 = arith.constant 0 : index
    %c128 = arith.constant 128 : index
    %69 = vector.load %arg11[%c0_60, %c128] : memref<32x1152xbf16, #tpu.memory_space<vmem>>, vector<32x128xbf16>
    tpu.vector_store %arg11[%c0_60, %c128], %68 {strides = array<i32>} : memref<32x1152xbf16, #tpu.memory_space<vmem>>, vector<32x128xbf16>,
    %c0_61 = arith.constant 0 : index
    %c9 = arith.constant 9 : index
    %c0_62 = arith.constant 0 : index
    %70 = vector.load %arg10[%c0_61, %c9, %c0_62] : memref<6x24x128xbf16, #tpu.memory_space<vmem>>, vector<4x8x128xbf16>
    %71 = vector.shape_cast %70 : vector<4x8x128xbf16> to vector<32x128xbf16>
    %c0_63 = arith.constant 0 : index
    %c256 = arith.constant 256 : index
    %72 = vector.load %arg11[%c0_63, %c256] : memref<32x1152xbf16, #tpu.memory_space<vmem>>, vector<32x128xbf16>
    tpu.vector_store %arg11[%c0_63, %c256], %71 {strides = array<i32>} : memref<32x1152xbf16, #tpu.memory_space<vmem>>, vector<32x128xbf16>,
    %c1_64 = arith.constant 1 : index
    %c7_65 = arith.constant 7 : index
    %c0_66 = arith.constant 0 : index
    %73 = vector.load %arg10[%c1_64, %c7_65, %c0_66] : memref<6x24x128xbf16, #tpu.memory_space<vmem>>, vector<4x8x128xbf16>
    %74 = vector.shape_cast %73 : vector<4x8x128xbf16> to vector<32x128xbf16>
    %c0_67 = arith.constant 0 : index
    %c384 = arith.constant 384 : index
    %75 = vector.load %arg11[%c0_67, %c384] : memref<32x1152xbf16, #tpu.memory_space<vmem>>, vector<32x128xbf16>
    tpu.vector_store %arg11[%c0_67, %c384], %74 {strides = array<i32>} : memref<32x1152xbf16, #tpu.memory_space<vmem>>, vector<32x128xbf16>,
    %c1_68 = arith.constant 1 : index
    %c8_69 = arith.constant 8 : index
    %c0_70 = arith.constant 0 : index
    %76 = vector.load %arg10[%c1_68, %c8_69, %c0_70] : memref<6x24x128xbf16, #tpu.memory_space<vmem>>, vector<4x8x128xbf16>
    %77 = vector.shape_cast %76 : vector<4x8x128xbf16> to vector<32x128xbf16>
    %c0_71 = arith.constant 0 : index
    %c512 = arith.constant 512 : index
    %78 = vector.load %arg11[%c0_71, %c512] : memref<32x1152xbf16, #tpu.memory_space<vmem>>, vector<32x128xbf16>
    tpu.vector_store %arg11[%c0_71, %c512], %77 {strides = array<i32>} : memref<32x1152xbf16, #tpu.memory_space<vmem>>, vector<32x128xbf16>,
    %c1_72 = arith.constant 1 : index
    %c9_73 = arith.constant 9 : index
    %c0_74 = arith.constant 0 : index
    %79 = vector.load %arg10[%c1_72, %c9_73, %c0_74] : memref<6x24x128xbf16, #tpu.memory_space<vmem>>, vector<4x8x128xbf16>
    %80 = vector.shape_cast %79 : vector<4x8x128xbf16> to vector<32x128xbf16>
    %c0_75 = arith.constant 0 : index
    %c640 = arith.constant 640 : index
    %81 = vector.load %arg11[%c0_75, %c640] : memref<32x1152xbf16, #tpu.memory_space<vmem>>, vector<32x128xbf16>
    tpu.vector_store %arg11[%c0_75, %c640], %80 {strides = array<i32>} : memref<32x1152xbf16, #tpu.memory_space<vmem>>, vector<32x128xbf16>,
    %c2 = arith.constant 2 : index
    %c7_76 = arith.constant 7 : index
    %c0_77 = arith.constant 0 : index
    %82 = vector.load %arg10[%c2, %c7_76, %c0_77] : memref<6x24x128xbf16, #tpu.memory_space<vmem>>, vector<4x8x128xbf16>
    %83 = vector.shape_cast %82 : vector<4x8x128xbf16> to vector<32x128xbf16>
    %c0_78 = arith.constant 0 : index
    %c768 = arith.constant 768 : index
    %84 = vector.load %arg11[%c0_78, %c768] : memref<32x1152xbf16, #tpu.memory_space<vmem>>, vector<32x128xbf16>
    tpu.vector_store %arg11[%c0_78, %c768], %83 {strides = array<i32>} : memref<32x1152xbf16, #tpu.memory_space<vmem>>, vector<32x128xbf16>,
    %c2_79 = arith.constant 2 : index
    %c8_80 = arith.constant 8 : index
    %c0_81 = arith.constant 0 : index
    %85 = vector.load %arg10[%c2_79, %c8_80, %c0_81] : memref<6x24x128xbf16, #tpu.memory_space<vmem>>, vector<4x8x128xbf16>
    %86 = vector.shape_cast %85 : vector<4x8x128xbf16> to vector<32x128xbf16>
    %c0_82 = arith.constant 0 : index
    %c896 = arith.constant 896 : index
    %87 = vector.load %arg11[%c0_82, %c896] : memref<32x1152xbf16, #tpu.memory_space<vmem>>, vector<32x128xbf16>
    tpu.vector_store %arg11[%c0_82, %c896], %86 {strides = array<i32>} : memref<32x1152xbf16, #tpu.memory_space<vmem>>, vector<32x128xbf16>,
    %c2_83 = arith.constant 2 : index
    %c9_84 = arith.constant 9 : index
    %c0_85 = arith.constant 0 : index
    %88 = vector.load %arg10[%c2_83, %c9_84, %c0_85] : memref<6x24x128xbf16, #tpu.memory_space<vmem>>, vector<4x8x128xbf16>
    %89 = vector.shape_cast %88 : vector<4x8x128xbf16> to vector<32x128xbf16>
    %c0_86 = arith.constant 0 : index
    %c1024 = arith.constant 1024 : index
    %90 = vector.load %arg11[%c0_86, %c1024] : memref<32x1152xbf16, #tpu.memory_space<vmem>>, vector<32x128xbf16>
    tpu.vector_store %arg11[%c0_86, %c1024], %89 {strides = array<i32>} : memref<32x1152xbf16, #tpu.memory_space<vmem>>, vector<32x128xbf16>,
    %c0_87 = arith.constant 0 : index
    %c0_88 = arith.constant 0 : index
    %91 = vector.load %arg11[%c0_87, %c0_88] : memref<32x1152xbf16, #tpu.memory_space<vmem>>, vector<32x1152xbf16>
    %c0_89 = arith.constant 0 : index
    %c0_90 = arith.constant 0 : index
    %92 = vector.load %arg6[%c0_89, %c0_90] : memref<1152x128xbf16, #tpu.memory_space<vmem>>, vector<1152x128xbf16>
    %cst_91 = arith.constant dense<0.000000e+00> : vector<32x128xf32>
    %93 = tpu.matmul %91, %92, %cst_91 {dimension_numbers = #tpu.dot_dimension_numbers<[1], [0], [0], [1], [0, 0, 1, 1], [], []>} : vector<32x1152xbf16>, vector<1152x128xbf16>, vector<32x128xf32> -> vector<32x128xf32>
    %94 = vector.shape_cast %93 : vector<32x128xf32> to vector<4x8x128xf32>
    %95 = arith.truncf %94 : vector<4x8x128xf32> to vector<4x8x128xbf16>
    %c0_92 = arith.constant 0 : index
    %c0_93 = arith.constant 0 : index
    %c0_94 = arith.constant 0 : index
    %c0_95 = arith.constant 0 : index
    %96 = vector.load %arg7[%c0_92, %c0_93, %c0_94, %c0_95] : memref<1x4x8x128xbf16, #tpu.memory_space<vmem>>, vector<1x4x8x128xbf16>
    %97 = vector.shape_cast %96 : vector<1x4x8x128xbf16> to vector<4x8x128xbf16>
    %98 = vector.shape_cast %95 : vector<4x8x128xbf16> to vector<1x4x8x128xbf16>
    tpu.vector_store %arg7[%c0_92, %c0_93, %c0_94, %c0_95], %98 {strides = array<i32>} : memref<1x4x8x128xbf16, #tpu.memory_space<vmem>>, vector<1x4x8x128xbf16>,
    %cst_96 = arith.constant dense<0.000000e+00> : vector<128xf32>
    %99 = vector.multi_reduction <add>, %93, %cst_96 [0] : vector<32x128xf32> to vector<128xf32>
    %100 = vector.shape_cast %99 : vector<128xf32> to vector<1x128xf32>
    %101 = vector.shape_cast %100 : vector<1x128xf32> to vector<1x1x128xf32>
    %102 = arith.mulf %93, %93 : vector<32x128xf32>
    %cst_97 = arith.constant dense<0.000000e+00> : vector<128xf32>
    %103 = vector.multi_reduction <add>, %102, %cst_97 [0] : vector<32x128xf32> to vector<128xf32>
    %104 = vector.shape_cast %103 : vector<128xf32> to vector<1x128xf32>
    %105 = vector.shape_cast %104 : vector<1x128xf32> to vector<1x1x128xf32>
    %c0_98 = arith.constant 0 : index
    %c0_99 = arith.constant 0 : index
    %c0_100 = arith.constant 0 : index
    %106 = vector.load %arg8[%c0_98, %c0_99, %c0_100] : memref<1x1x128xf32, #tpu.memory_space<vmem>>, vector<1x1x128xf32>
    tpu.vector_store %arg8[%c0_98, %c0_99, %c0_100], %101 {strides = array<i32>} : memref<1x1x128xf32, #tpu.memory_space<vmem>>, vector<1x1x128xf32>,
    %c0_101 = arith.constant 0 : index
    %c0_102 = arith.constant 0 : index
    %c0_103 = arith.constant 0 : index
    %107 = vector.load %arg9[%c0_101, %c0_102, %c0_103] : memref<1x1x128xf32, #tpu.memory_space<vmem>>, vector<1x1x128xf32>
    tpu.vector_store %arg9[%c0_101, %c0_102, %c0_103], %105 {strides = array<i32>} : memref<1x1x128xf32, #tpu.memory_space<vmem>>, vector<1x1x128xf32>,
    return
  }
  func.func @transform_0(%arg0: i32, %arg1: i32) -> (i32, i32, i32, i32) {
    %c0_i32 = arith.constant 0 : i32
    %c0_i32_0 = arith.constant 0 : i32
    %c0_i32_1 = arith.constant 0 : i32
    return %arg0, %arg1, %c0_i32, %c0_i32_0 : i32, i32, i32, i32
  }
  func.func @transform_2(%arg0: i32, %arg1: i32) -> (i32, i32) {
    %c0_i32 = arith.constant 0 : i32
    %c0_i32_0 = arith.constant 0 : i32
    %c0_i32_1 = arith.constant 0 : i32
    return %c0_i32, %c0_i32_0 : i32, i32
  }
  func.func @transform_3(%arg0: i32, %arg1: i32) -> (i32, i32) {
    %c0_i32 = arith.constant 0 : i32
    %c0_i32_0 = arith.constant 0 : i32
    %c0_i32_1 = arith.constant 0 : i32
    return %c0_i32, %c0_i32_0 : i32, i32
  }
  func.func @transform_4(%arg0: i32, %arg1: i32) -> (i32, i32) {
    %c0_i32 = arith.constant 0 : i32
    %c0_i32_0 = arith.constant 0 : i32
    %c0_i32_1 = arith.constant 0 : i32
    return %c0_i32, %c0_i32_0 : i32, i32
  }
  func.func @transform_5(%arg0: i32, %arg1: i32) -> (i32, i32, i32, i32) {
    %c0_i32 = arith.constant 0 : i32
    %c0_i32_0 = arith.constant 0 : i32
    %c0_i32_1 = arith.constant 0 : i32
    return %arg0, %arg1, %c0_i32, %c0_i32_0 : i32, i32, i32, i32
  }
  func.func @transform_6(%arg0: i32, %arg1: i32) -> (i32, i32, i32) {
    %c2_i32 = arith.constant 2 : i32
    %0 = arith.muli %arg0, %c2_i32 : i32
    %1 = arith.addi %0, %arg1 : i32
    %c0_i32 = arith.constant 0 : i32
    %c0_i32_0 = arith.constant 0 : i32
    %c0_i32_1 = arith.constant 0 : i32
    return %1, %c0_i32, %c0_i32_0 : i32, i32, i32
  }
  func.func @transform_7(%arg0: i32, %arg1: i32) -> (i32, i32, i32) {
    %c2_i32 = arith.constant 2 : i32
    %0 = arith.muli %arg0, %c2_i32 : i32
    %1 = arith.addi %0, %arg1 : i32
    %c0_i32 = arith.constant 0 : i32
    %c0_i32_0 = arith.constant 0 : i32
    %c0_i32_1 = arith.constant 0 : i32
    return %1, %c0_i32, %c0_i32_0 : i32, i32, i32
  }
}

module attributes {stable_mosaic.version = 11 : i64} {
  func.func @bn_relu_conv1_stats_kernel(%arg0: i32, %arg1: memref<128x128xbf16, #tpu.memory_space<vmem>>, %arg2: memref<1x128xf32, #tpu.memory_space<vmem>>, %arg3: memref<1x128xf32, #tpu.memory_space<vmem>>, %arg4: memref<128x128xbf16, #tpu.memory_space<vmem>>, %arg5: memref<128x128xbf16, #tpu.memory_space<vmem>>, %arg6: memref<1x1x128xf32, #tpu.memory_space<vmem>>, %arg7: memref<1x1x128xf32, #tpu.memory_space<vmem>>) attributes {dimension_semantics = [#tpu.dimension_semantics<parallel>], iteration_bounds = array<i64: 1>, scalar_prefetch = 0 : i64, scratch_operands = 0 : i64, tpu.core_type = #tpu.core_type<tc>, window_params = [{transform_indices = @transform_0, window_bounds = array<i64: 128, 128>}, {pipeline_mode = #tpu.pipeline_mode<synchronous>, transform_indices = @transform_1, window_bounds = array<i64: 1, 128>}, {pipeline_mode = #tpu.pipeline_mode<synchronous>, transform_indices = @transform_2, window_bounds = array<i64: 1, 128>}, {pipeline_mode = #tpu.pipeline_mode<synchronous>, transform_indices = @transform_3, window_bounds = array<i64: 128, 128>}, {transform_indices = @transform_4, window_bounds = array<i64: 128, 128>}, {transform_indices = @transform_5, window_bounds = array<i64: 1, 1, 128>}, {transform_indices = @transform_6, window_bounds = array<i64: 1, 1, 128>}]} {
    %c0 = arith.constant 0 : index
    %c0_0 = arith.constant 0 : index
    %0 = vector.load %arg1[%c0, %c0_0] : memref<128x128xbf16, #tpu.memory_space<vmem>>, vector<128x128xbf16>
    %1 = arith.extf %0 : vector<128x128xbf16> to vector<128x128xf32>
    %c0_1 = arith.constant 0 : index
    %c0_2 = arith.constant 0 : index
    %2 = vector.load %arg2[%c0_1, %c0_2] : memref<1x128xf32, #tpu.memory_space<vmem>>, vector<1x128xf32>
    %3 = vector.broadcast %2 : vector<1x128xf32> to vector<128x128xf32>
    %4 = arith.mulf %1, %3 : vector<128x128xf32>
    %c0_3 = arith.constant 0 : index
    %c0_4 = arith.constant 0 : index
    %5 = vector.load %arg3[%c0_3, %c0_4] : memref<1x128xf32, #tpu.memory_space<vmem>>, vector<1x128xf32>
    %6 = vector.broadcast %5 : vector<1x128xf32> to vector<128x128xf32>
    %7 = arith.addf %4, %6 : vector<128x128xf32>
    %cst = arith.constant 0.000000e+00 : f32
    %8 = vector.broadcast %cst : f32 to vector<128x128xf32>
    %9 = arith.maximumf %7, %8 : vector<128x128xf32>
    %10 = arith.truncf %9 : vector<128x128xf32> to vector<128x128xbf16>
    %c0_5 = arith.constant 0 : index
    %c0_6 = arith.constant 0 : index
    %11 = vector.load %arg4[%c0_5, %c0_6] : memref<128x128xbf16, #tpu.memory_space<vmem>>, vector<128x128xbf16>
    %cst_7 = arith.constant dense<0.000000e+00> : vector<128x128xf32>
    %12 = tpu.matmul %10, %11, %cst_7 {dimension_numbers = #tpu.dot_dimension_numbers<[1], [0], [0], [1], [0, 0, 1, 1], [], []>} : vector<128x128xbf16>, vector<128x128xbf16>, vector<128x128xf32> -> vector<128x128xf32>
    %13 = arith.truncf %12 : vector<128x128xf32> to vector<128x128xbf16>
    %c0_8 = arith.constant 0 : index
    %c0_9 = arith.constant 0 : index
    %14 = vector.load %arg5[%c0_8, %c0_9] : memref<128x128xbf16, #tpu.memory_space<vmem>>, vector<128x128xbf16>
    tpu.vector_store %arg5[%c0_8, %c0_9], %13 {strides = array<i32>} : memref<128x128xbf16, #tpu.memory_space<vmem>>, vector<128x128xbf16>,
    %cst_10 = arith.constant dense<0.000000e+00> : vector<128xf32>
    %15 = vector.multi_reduction <add>, %12, %cst_10 [0] : vector<128x128xf32> to vector<128xf32>
    %16 = vector.shape_cast %15 : vector<128xf32> to vector<1x128xf32>
    %17 = vector.shape_cast %16 : vector<1x128xf32> to vector<1x1x128xf32>
    %18 = arith.mulf %12, %12 : vector<128x128xf32>
    %cst_11 = arith.constant dense<0.000000e+00> : vector<128xf32>
    %19 = vector.multi_reduction <add>, %18, %cst_11 [0] : vector<128x128xf32> to vector<128xf32>
    %20 = vector.shape_cast %19 : vector<128xf32> to vector<1x128xf32>
    %21 = vector.shape_cast %20 : vector<1x128xf32> to vector<1x1x128xf32>
    %c0_12 = arith.constant 0 : index
    %c0_13 = arith.constant 0 : index
    %c0_14 = arith.constant 0 : index
    %22 = vector.load %arg6[%c0_12, %c0_13, %c0_14] : memref<1x1x128xf32, #tpu.memory_space<vmem>>, vector<1x1x128xf32>
    tpu.vector_store %arg6[%c0_12, %c0_13, %c0_14], %17 {strides = array<i32>} : memref<1x1x128xf32, #tpu.memory_space<vmem>>, vector<1x1x128xf32>,
    %c0_15 = arith.constant 0 : index
    %c0_16 = arith.constant 0 : index
    %c0_17 = arith.constant 0 : index
    %23 = vector.load %arg7[%c0_15, %c0_16, %c0_17] : memref<1x1x128xf32, #tpu.memory_space<vmem>>, vector<1x1x128xf32>
    tpu.vector_store %arg7[%c0_15, %c0_16, %c0_17], %21 {strides = array<i32>} : memref<1x1x128xf32, #tpu.memory_space<vmem>>, vector<1x1x128xf32>,
    return
  }
  func.func @transform_0(%arg0: i32) -> (i32, i32) {
    %c0_i32 = arith.constant 0 : i32
    %c0_i32_0 = arith.constant 0 : i32
    return %arg0, %c0_i32 : i32, i32
  }
  func.func @transform_1(%arg0: i32) -> (i32, i32) {
    %c0_i32 = arith.constant 0 : i32
    %c0_i32_0 = arith.constant 0 : i32
    %c0_i32_1 = arith.constant 0 : i32
    return %c0_i32, %c0_i32_0 : i32, i32
  }
  func.func @transform_2(%arg0: i32) -> (i32, i32) {
    %c0_i32 = arith.constant 0 : i32
    %c0_i32_0 = arith.constant 0 : i32
    %c0_i32_1 = arith.constant 0 : i32
    return %c0_i32, %c0_i32_0 : i32, i32
  }
  func.func @transform_3(%arg0: i32) -> (i32, i32) {
    %c0_i32 = arith.constant 0 : i32
    %c0_i32_0 = arith.constant 0 : i32
    %c0_i32_1 = arith.constant 0 : i32
    return %c0_i32, %c0_i32_0 : i32, i32
  }
  func.func @transform_4(%arg0: i32) -> (i32, i32) {
    %c0_i32 = arith.constant 0 : i32
    %c0_i32_0 = arith.constant 0 : i32
    return %arg0, %c0_i32 : i32, i32
  }
  func.func @transform_5(%arg0: i32) -> (i32, i32, i32) {
    %c0_i32 = arith.constant 0 : i32
    %c0_i32_0 = arith.constant 0 : i32
    %c0_i32_1 = arith.constant 0 : i32
    return %arg0, %c0_i32, %c0_i32_0 : i32, i32, i32
  }
  func.func @transform_6(%arg0: i32) -> (i32, i32, i32) {
    %c0_i32 = arith.constant 0 : i32
    %c0_i32_0 = arith.constant 0 : i32
    %c0_i32_1 = arith.constant 0 : i32
    return %arg0, %c0_i32, %c0_i32_0 : i32, i32, i32
  }
}

module attributes {stable_mosaic.version = 11 : i64} {
  func.func @bn_add_relu_kernel(%arg0: i32, %arg1: memref<128x128xbf16, #tpu.memory_space<vmem>>, %arg2: memref<1x128xf32, #tpu.memory_space<vmem>>, %arg3: memref<1x128xf32, #tpu.memory_space<vmem>>, %arg4: memref<128x128xbf16, #tpu.memory_space<vmem>>, %arg5: memref<128x128xbf16, #tpu.memory_space<vmem>>) attributes {dimension_semantics = [#tpu.dimension_semantics<parallel>], iteration_bounds = array<i64: 1>, scalar_prefetch = 0 : i64, scratch_operands = 0 : i64, tpu.core_type = #tpu.core_type<tc>, window_params = [{transform_indices = @transform_0, window_bounds = array<i64: 128, 128>}, {pipeline_mode = #tpu.pipeline_mode<synchronous>, transform_indices = @transform_1, window_bounds = array<i64: 1, 128>}, {pipeline_mode = #tpu.pipeline_mode<synchronous>, transform_indices = @transform_2, window_bounds = array<i64: 1, 128>}, {transform_indices = @transform_3, window_bounds = array<i64: 128, 128>}, {transform_indices = @transform_4, window_bounds = array<i64: 128, 128>}]} {
    %c0 = arith.constant 0 : index
    %c0_0 = arith.constant 0 : index
    %0 = vector.load %arg1[%c0, %c0_0] : memref<128x128xbf16, #tpu.memory_space<vmem>>, vector<128x128xbf16>
    %1 = arith.extf %0 : vector<128x128xbf16> to vector<128x128xf32>
    %c0_1 = arith.constant 0 : index
    %c0_2 = arith.constant 0 : index
    %2 = vector.load %arg2[%c0_1, %c0_2] : memref<1x128xf32, #tpu.memory_space<vmem>>, vector<1x128xf32>
    %3 = vector.broadcast %2 : vector<1x128xf32> to vector<128x128xf32>
    %4 = arith.mulf %1, %3 : vector<128x128xf32>
    %c0_3 = arith.constant 0 : index
    %c0_4 = arith.constant 0 : index
    %5 = vector.load %arg3[%c0_3, %c0_4] : memref<1x128xf32, #tpu.memory_space<vmem>>, vector<1x128xf32>
    %6 = vector.broadcast %5 : vector<1x128xf32> to vector<128x128xf32>
    %7 = arith.addf %4, %6 : vector<128x128xf32>
    %c0_5 = arith.constant 0 : index
    %c0_6 = arith.constant 0 : index
    %8 = vector.load %arg4[%c0_5, %c0_6] : memref<128x128xbf16, #tpu.memory_space<vmem>>, vector<128x128xbf16>
    %9 = arith.extf %8 : vector<128x128xbf16> to vector<128x128xf32>
    %10 = arith.addf %7, %9 : vector<128x128xf32>
    %cst = arith.constant 0.000000e+00 : f32
    %11 = vector.broadcast %cst : f32 to vector<128x128xf32>
    %12 = arith.maximumf %10, %11 : vector<128x128xf32>
    %13 = arith.truncf %12 : vector<128x128xf32> to vector<128x128xbf16>
    %c0_7 = arith.constant 0 : index
    %c0_8 = arith.constant 0 : index
    %14 = vector.load %arg5[%c0_7, %c0_8] : memref<128x128xbf16, #tpu.memory_space<vmem>>, vector<128x128xbf16>
    tpu.vector_store %arg5[%c0_7, %c0_8], %13 {strides = array<i32>} : memref<128x128xbf16, #tpu.memory_space<vmem>>, vector<128x128xbf16>,
    return
  }
  func.func @transform_0(%arg0: i32) -> (i32, i32) {
    %c0_i32 = arith.constant 0 : i32
    %c0_i32_0 = arith.constant 0 : i32
    return %arg0, %c0_i32 : i32, i32
  }
  func.func @transform_1(%arg0: i32) -> (i32, i32) {
    %c0_i32 = arith.constant 0 : i32
    %c0_i32_0 = arith.constant 0 : i32
    %c0_i32_1 = arith.constant 0 : i32
    return %c0_i32, %c0_i32_0 : i32, i32
  }
  func.func @transform_2(%arg0: i32) -> (i32, i32) {
    %c0_i32 = arith.constant 0 : i32
    %c0_i32_0 = arith.constant 0 : i32
    %c0_i32_1 = arith.constant 0 : i32
    return %c0_i32, %c0_i32_0 : i32, i32
  }
  func.func @transform_3(%arg0: i32) -> (i32, i32) {
    %c0_i32 = arith.constant 0 : i32
    %c0_i32_0 = arith.constant 0 : i32
    return %arg0, %c0_i32 : i32, i32
  }
  func.func @transform_4(%arg0: i32) -> (i32, i32) {
    %c0_i32 = arith.constant 0 : i32
    %c0_i32_0 = arith.constant 0 : i32
    return %arg0, %c0_i32 : i32, i32
  }
}

</mosaic_0001>

<bundles_post_ra>
// kernel: bottleneck_forward.7
= control target key start
LH: loop header
LB: loop body
LE: loop exit
PB: predicated region body
PF: predicated region fallthrough
CT: control target
= control target key end

     0   :  { %s541_s0 = inlined_call_operand.vmem [shape: bf16[128,128], index: 0, kind: input, shape index: {}]   ;;  %s542_s1 = inlined_call_operand.vmem [shape: f32[1,128], index: 1, kind: input, shape index: {}]   ;;  %s543_s2 = inlined_call_operand.vmem [shape: f32[1,128], index: 2, kind: input, shape index: {}]   ;;  %s544_s3 = inlined_call_operand.vmem [shape: bf16[128,128], index: 3, kind: input, shape index: {}, may-alias: {3,4}]   ;;  %s545_s4 = inlined_call_operand.vmem [shape: bf16[128,128], index: 4, kind: output, shape index: {}, may-alias: {3,4}]  }
   0x1   :  { %v278_v0 = vld [vmem:[%s541_s0] sm:$0xff]   ;;  %v381_v5 = vld [vmem:[%s541_s0 + $0x8] sm:$0xff]   ;;  %v382_v12 = vld [vmem:[%s541_s0 + $0x10] sm:$0xff]  }
   0x2   :  { %v433_v1 = vld [vmem:[%s542_s1] ss:$0 sm:$0xff]  ;;  %v279_v2 = vunpack.c.l.bf16 %v278_v0  ;;  %v280_v3 = vunpack.c.h.bf16 %v278_v0  ;;  %v388_v6 = vld [vmem:[%s544_s3 + $0x8] sm:$0xff]   ;;  %v283_v10 = vunpack.c.l.bf16 %v381_v5  ;;  %v284_v11 = vunpack.c.h.bf16 %v381_v5  ;;  %v389_v13 = vld [vmem:[%s544_s3 + $0x10] sm:$0xff]  }
   0x3   :  { %v310_v4 = vld [vmem:[%s544_s3] sm:$0xff]   ;;  %v315_v16 = vunpack.c.l.bf16 %v388_v6  ;;  %v316_v17 = vunpack.c.h.bf16 %v388_v6  ;;  %v287_v20 = vunpack.c.l.bf16 %v382_v12  ;;  %v288_v21 = vunpack.c.h.bf16 %v382_v12  ;;  %v383_v22 = vld [vmem:[%s541_s0 + $0x18] sm:$0xff]   ;;  %v385_v54 = vld [vmem:[%s541_s0 + $0x28] sm:$0xff]  }
   0x4   :  { %v447_v7 = vld [vmem:[%s543_s2] ss:$0 sm:$0xff]  ;;  %v311_v8 = vunpack.c.l.bf16 %v310_v4  ;;  %v312_v9 = vunpack.c.h.bf16 %v310_v4  ;;  %v56_v14 = vmul.f32 %v279_v2, %v433_v1  ;;  %v57_v15 = vmul.f32 %v280_v3, %v433_v1  ;;  %v390_v39 = vld [vmem:[%s544_s3 + $0x18] sm:$0xff]   ;;  %v386_v5 = vld [vmem:[%s541_s0 + $0x30] sm:$0xff]  }
   0x5   :  { %v58_v18 = vmul.f32 %v283_v10, %v433_v1  ;;  %v59_v19 = vmul.f32 %v284_v11, %v433_v1  ;;  %v319_v25 = vunpack.c.l.bf16 %v389_v13  ;;  %v320_v26 = vunpack.c.h.bf16 %v389_v13  ;;  %v384_v48 = vld [vmem:[%s541_s0 + $0x20] sm:$0xff]  }
   0x6   :  { %v79_v23 = vadd.f32 %v447_v7, %v56_v14  ;;  %v80_v24 = vadd.f32 %v447_v7, %v57_v15  ;;  %v60_v29 = vmul.f32 %v287_v20, %v433_v1  ;;  %v61_v30 = vmul.f32 %v288_v21, %v433_v1  ;;  %v391_v49 = vld [vmem:[%s544_s3 + $0x20] sm:$0xff]   ;;  %v387_v20 = vld [vmem:[%s541_s0 + $0x38] sm:$0xff]  }
   0x7   :  { %v81_v27 = vadd.f32 %v447_v7, %v58_v18  ;;  %v82_v28 = vadd.f32 %v447_v7, %v59_v19  ;;  %v291_v33 = vunpack.c.l.bf16 %v383_v22  ;;  %v292_v34 = vunpack.c.h.bf16 %v383_v22 }
   0x8   :  { %v127_v31 = vadd.f32 %v311_v8, %v79_v23  ;;  %v128_v32 = vadd.f32 %v312_v9, %v80_v24  ;;  %v83_v37 = vadd.f32 %v447_v7, %v60_v29  ;;  %v84_v38 = vadd.f32 %v447_v7, %v61_v30 }
   0x9   :  { %v129_v35 = vadd.f32 %v315_v16, %v81_v27  ;;  %v130_v36 = vadd.f32 %v316_v17, %v82_v28  ;;  %v62_v42 = vmul.f32 %v291_v33, %v433_v1  ;;  %v63_v43 = vmul.f32 %v292_v34, %v433_v1 }
   0xa   :  { %v143_v40 = vmax.f32 %v127_v31, 0.0  ;;  %v144_v41 = vmax.f32 %v128_v32, 0.0  ;;  %v131_v46 = vadd.f32 %v319_v25, %v83_v37  ;;  %v132_v47 = vadd.f32 %v320_v26, %v84_v38 }
   0xb   :  { %v145_v44 = vmax.f32 %v129_v35, 0.0  ;;  %v146_v45 = vmax.f32 %v130_v36, 0.0  ;;  %v85_v51 = vadd.f32 %v447_v7, %v62_v42  ;;  %v86_v52 = vadd.f32 %v447_v7, %v63_v43 }
   0xc   :  { %v344_v50 = vpack.c.bf16 %v144_v41, %v143_v40  ;;  %v323_v53 = vunpack.c.l.bf16 %v390_v39  ;;  %v147_v56 = vmax.f32 %v131_v46, 0.0  ;;  %v148_v57 = vmax.f32 %v132_v47, 0.0 }
   0xd   :  { %v349_v55 = vpack.c.bf16 %v146_v45, %v145_v44  ;;  %v324_v58 = vunpack.c.h.bf16 %v390_v39  ;;  %v295_v60 = vunpack.c.l.bf16 %v384_v48  ;;  %v296_v61 = vunpack.c.h.bf16 %v384_v48 }
   0xe   :  { %345 = vst [vmem:[%s545_s4] sm:$0xff] %v344_v50   ;;  %v133_v59 = vadd.f32 %v323_v53, %v85_v51  ;;  %v327_v62 = vunpack.c.l.bf16 %v391_v49  ;;  %v354_v0 = vpack.c.bf16 %v148_v57, %v147_v56  ;;  %v328_v3 = vunpack.c.h.bf16 %v391_v49 }
   0xf   :  { %v134_v2 = vadd.f32 %v324_v58, %v86_v52  ;;  %v299_v4 = vunpack.c.l.bf16 %v385_v54  ;;  %v64_v8 = vmul.f32 %v295_v60, %v433_v1  ;;  %v65_v9 = vmul.f32 %v296_v61, %v433_v1 }
  0x10   :  { %v149_v6 = vmax.f32 %v133_v59, 0.0  ;;  %v300_v10 = vunpack.c.h.bf16 %v385_v54  ;;  %v303_v19 = vunpack.c.l.bf16 %v386_v5  ;;  %v304_v23 = vunpack.c.h.bf16 %v386_v5 }
  0x11   :  { %v150_v12 = vmax.f32 %v134_v2, 0.0  ;;  %v66_v13 = vmul.f32 %v299_v4, %v433_v1  ;;  %v87_v16 = vadd.f32 %v447_v7, %v64_v8  ;;  %v88_v17 = vadd.f32 %v447_v7, %v65_v9 }
  0x12   :  { %v67_v18 = vmul.f32 %v300_v10, %v433_v1  ;;  %v68_v28 = vmul.f32 %v303_v19, %v433_v1  ;;  %v69_v30 = vmul.f32 %v304_v23, %v433_v1  ;;  %v307_v32 = vunpack.c.l.bf16 %v387_v20 }
  0x13   :  { %v359_v21 = vpack.c.bf16 %v150_v12, %v149_v6  ;;  %v89_v22 = vadd.f32 %v447_v7, %v66_v13  ;;  %v135_v25 = vadd.f32 %v327_v62, %v87_v16  ;;  %v136_v26 = vadd.f32 %v328_v3, %v88_v17 }
  0x14   :  { %v90_v27 = vadd.f32 %v447_v7, %v67_v18  ;;  %v91_v37 = vadd.f32 %v447_v7, %v68_v28  ;;  %v92_v39 = vadd.f32 %v447_v7, %v69_v30  ;;  %v308_v40 = vunpack.c.h.bf16 %v387_v20 }
  0x15   :  { %v392_v63 = vld [vmem:[%s544_s3 + $0x28] sm:$0xff]   ;;  %v151_v34 = vmax.f32 %v135_v25, 0.0  ;;  %v152_v35 = vmax.f32 %v136_v26, 0.0  ;;  %v70_v41 = vmul.f32 %v307_v32, %v433_v1 }
  0x16   :  { %395 = vst [vmem:[%s545_s4 + $0x8] sm:$0xff] %v349_v55   ;;  %v331_v14 = vunpack.c.l.bf16 %v392_v63  ;;  %v332_v15 = vunpack.c.h.bf16 %v392_v63  ;;  %v71_v47 = vmul.f32 %v308_v40, %v433_v1 }
  0x17   :  { %v364_v42 = vpack.c.bf16 %v152_v35, %v151_v34  ;;  %v93_v48 = vadd.f32 %v447_v7, %v70_v41 }
  0x18   :  { %v137_v29 = vadd.f32 %v331_v14, %v89_v22  ;;  %v138_v36 = vadd.f32 %v332_v15, %v90_v27  ;;  %v94_v53 = vadd.f32 %v447_v7, %v71_v47 }
  0x1a   :  { %v153_v38 = vmax.f32 %v137_v29, 0.0  ;;  %v154_v43 = vmax.f32 %v138_v36, 0.0 }
  0x1c   :  { %v369_v50 = vpack.c.bf16 %v154_v43, %v153_v38 }
  0x1d   :  { %v393_v11 = vld [vmem:[%s544_s3 + $0x30] sm:$0xff]  }
  0x1e   :  { %396 = vst [vmem:[%s545_s4 + $0x10] sm:$0xff] %v354_v0   ;;  %v335_v24 = vunpack.c.l.bf16 %v393_v11  ;;  %397 = vst [vmem:[%s545_s4 + $0x18] sm:$0xff] %v359_v21   ;;  %v336_v31 = vunpack.c.h.bf16 %v393_v11 }
  0x20   :  { %v139_v44 = vadd.f32 %v335_v24, %v91_v37  ;;  %v140_v46 = vadd.f32 %v336_v31, %v92_v39 }
  0x22   :  { %v155_v51 = vmax.f32 %v139_v44, 0.0  ;;  %v156_v52 = vmax.f32 %v140_v46, 0.0 }
  0x24   :  { %v374_v55 = vpack.c.bf16 %v156_v52, %v155_v51 }
  0x25   :  { %v394_v33 = vld [vmem:[%s544_s3 + $0x38] sm:$0xff]  }
  0x26   :  { %v339_v45 = vunpack.c.l.bf16 %v394_v33  ;;  %v340_v49 = vunpack.c.h.bf16 %v394_v33  ;;  %398 = vst [vmem:[%s545_s4 + $0x20] sm:$0xff] %v364_v42   ;;  %399 = vst [vmem:[%s545_s4 + $0x28] sm:$0xff] %v369_v50  }
  0x27   :  { %400 = vst [vmem:[%s545_s4 + $0x30] sm:$0xff] %v374_v55  }
  0x28   :  { %v141_v54 = vadd.f32 %v339_v45, %v93_v48  ;;  %v142_v56 = vadd.f32 %v340_v49, %v94_v53 }
  0x2a   :  { %v157_v1 = vmax.f32 %v141_v54, 0.0  ;;  %v158_v57 = vmax.f32 %v142_v56, 0.0 }
  0x2c   :  { %v379_v58 = vpack.c.bf16 %v158_v57, %v157_v1 }
  0x2e   :  { %401 = vst [vmem:[%s545_s4 + $0x38] sm:$0xff] %v379_v58  }

// kernel: bottleneck_forward.4
= control target key start
LH: loop header
LB: loop body
LE: loop exit
PB: predicated region body
PF: predicated region fallthrough
CT: control target
= control target key end

     0   :  { %s670_s1 = inlined_call_operand.vmem [shape: bf16[128,128], index: 1, kind: input, shape index: {}]   ;;  %s671_s0 = inlined_call_operand.vmem [shape: bf16[128,128], index: 0, kind: input, shape index: {}]   ;;  %s672_s2 = inlined_call_operand.vmem [shape: bf16[128,128], index: 2, kind: output, shape index: {0}]   ;;  %s673_s3 = inlined_call_operand.vmem [shape: f32[1,1,128], index: 3, kind: output, shape index: {1}]   ;;  %s674_s4 = inlined_call_operand.vmem [shape: f32[1,1,128], index: 4, kind: output, shape index: {2}]  }
   0x1   :  { %v551_v0 = vld [vmem:[%s670_s1] sm:$0xff]   ;;  %v552_v1 = vld [vmem:[%s670_s1 + $0x8] sm:$0xff]   ;;  %v553_v2 = vld [vmem:[%s670_s1 + $0x10] sm:$0xff]  }
   0x2   :  { %503 = vmatprep.subr.bf16.mxu0 %v551_v0  ;;  %535 = vmatprep.subr.bf16.mxu1 %v551_v0  ;;  %v554_v3 = vld [vmem:[%s670_s1 + $0x18] sm:$0xff]   ;;  %v559_v4 = vld [vmem:[%s671_s0] sm:$0xff]   ;;  %v556_v7 = vld [vmem:[%s670_s1 + $0x28] sm:$0xff]  }
   0x3   :  { %504 = vmatpush3.bf16.msra.mxu0 %v551_v0  ;;  %543 = vmatpush3.bf16.msra.mxu1 %v551_v0  ;;  %v555_v5 = vld [vmem:[%s670_s1 + $0x20] sm:$0xff]   ;;  %v557_v8 = vld [vmem:[%s670_s1 + $0x30] sm:$0xff]   ;;  %v558_v9 = vld [vmem:[%s670_s1 + $0x38] sm:$0xff]  }
   0x4   :  { %505 = vmatprep.subr.bf16.mxu0 %v552_v1  ;;  %536 = vmatprep.subr.bf16.mxu1 %v552_v1  ;;  %v563_v6 = vld [vmem:[%s671_s0 + $0x20] sm:$0xff]   ;;  %v560_v10 = vld [vmem:[%s671_s0 + $0x8] sm:$0xff]   ;;  %v561_v12 = vld [vmem:[%s671_s0 + $0x10] sm:$0xff]  }
   0x5   :  { %519 = vmatprep.mubr.bf16.mxu0 %v559_v4  ;;  %527 = vmatprep.mubr.bf16.mxu1 %v563_v6  ;;  %v564_v11 = vld [vmem:[%s671_s0 + $0x28] sm:$0xff]   ;;  %v565_v13 = vld [vmem:[%s671_s0 + $0x30] sm:$0xff]   ;;  %v562_v14 = vld [vmem:[%s671_s0 + $0x18] sm:$0xff]  }
   0x6   :  { %v566_v15 = vld [vmem:[%s671_s0 + $0x38] sm:$0xff]  }
   0x7   :  { %506 = vmatpush3.bf16.msra.mxu0 %v552_v1  ;;  %544 = vmatpush3.bf16.msra.mxu1 %v552_v1 }
   0x8   :  { %507 = vmatprep.subr.bf16.mxu0 %v553_v2  ;;  %537 = vmatprep.subr.bf16.mxu1 %v553_v2 }
   0xb   :  { %508 = vmatpush3.bf16.msra.mxu0 %v553_v2  ;;  %545 = vmatpush3.bf16.msra.mxu1 %v553_v2 }
   0xc   :  { %509 = vmatprep.subr.bf16.mxu0 %v554_v3  ;;  %538 = vmatprep.subr.bf16.mxu1 %v554_v3 }
   0xf   :  { %510 = vmatpush3.bf16.msra.mxu0 %v554_v3  ;;  %546 = vmatpush3.bf16.msra.mxu1 %v554_v3 }
  0x10   :  { %511 = vmatprep.subr.bf16.mxu0 %v555_v5  ;;  %539 = vmatprep.subr.bf16.mxu1 %v555_v5 }
  0x13   :  { %512 = vmatpush3.bf16.msra.mxu0 %v555_v5  ;;  %547 = vmatpush3.bf16.msra.mxu1 %v555_v5 }
  0x14   :  { %513 = vmatprep.subr.bf16.mxu0 %v556_v7  ;;  %540 = vmatprep.subr.bf16.mxu1 %v556_v7 }
  0x17   :  { %514 = vmatpush3.bf16.msra.mxu0 %v556_v7  ;;  %548 = vmatpush3.bf16.msra.mxu1 %v556_v7 }
  0x18   :  { %515 = vmatprep.subr.bf16.mxu0 %v557_v8  ;;  %541 = vmatprep.subr.bf16.mxu1 %v557_v8 }
  0x1b   :  { %516 = vmatpush3.bf16.msra.mxu0 %v557_v8  ;;  %549 = vmatpush3.bf16.msra.mxu1 %v557_v8 }
  0x1c   :  { %517 = vmatprep.subr.bf16.mxu0 %v558_v9  ;;  %542 = vmatprep.subr.bf16.mxu1 %v558_v9 }
  0x1f   :  { %518 = vmatpush3.bf16.msra.mxu0 %v558_v9  ;;  %550 = vmatpush3.bf16.msra.mxu1 %v558_v9 }
  0x22   :  { %520 = vmatmul.mubr.bf16.vlgmr.msra.gmra.mrb[0].mxu0 %v560_v10  ;;  %528 = vmatmul.mubr.bf16.vlgmr.msra.gmra.mrb[0].mxu1 %v564_v11 }
  0x23   :  { %523 = vmatprep.mubr.bf16.mxu0 %v561_v12  ;;  %531 = vmatprep.mubr.bf16.mxu1 %v565_v13 }
  0x2a   :  { %524 = vmatmul.mubr.bf16.gmra.mrb[4].mxu0 %v562_v14  ;;  %532 = vmatmul.mubr.bf16.gmra.mrb[4].mxu1 %v566_v15 }
  0xf5   :  { %v521_v16 = vpop.f32.mrb[0].mxu0  ;;  %v529_v17 = vpop.f32.mrb[0].mxu1 }
  0xf6   :  { %v177_v18 = vpop.f32.mrb[1].mxu0  ;;  %v209_v19 = vpop.f32.mrb[1].mxu1  ;;  %v343_v31 = vmul.f32 %v521_v16, %v521_v16  ;;  %v351_v3 = vmul.f32 %v529_v17, %v529_v17 }
  0xf7   :  { %v522_v20 = vpop.f32.mrb[2].mxu0  ;;  %v530_v21 = vpop.f32.mrb[2].mxu1  ;;  %v341_v22 = vmul.f32 %v177_v18, %v177_v18  ;;  %v349_v61 = vmul.f32 %v209_v19, %v209_v19 }
  0xf8   :  { %v448_v23 = vpack.c.bf16 %v522_v20, %v521_v16  ;;  %v180_v24 = vpop.f32.mrb[3].mxu0  ;;  %v468_v25 = vpack.c.bf16 %v530_v21, %v529_v17  ;;  %v212_v26 = vpop.f32.mrb[3].mxu1  ;;  %v344_v34 = vmul.f32 %v522_v20, %v522_v20  ;;  %v352_v6 = vmul.f32 %v530_v21, %v530_v21 }
  0xf9   :  { %v443_v27 = vpack.c.bf16 %v180_v24, %v177_v18  ;;  %v320_v28 = vadd.f32 %v180_v24, %v177_v18  ;;  %v342_v29 = vmul.f32 %v180_v24, %v180_v24  ;;  %v463_v30 = vpack.c.bf16 %v212_v26, %v209_v19 }
  0xfa   :  { %480 = vst [vmem:[%s672_s2 + $0x8] sm:$0xff] %v448_v23   ;;  %484 = vst [vmem:[%s672_s2 + $0x28] sm:$0xff] %v468_v25   ;;  %v350_v2 = vmul.f32 %v212_v26, %v212_v26 }
  0xfb   :  { %444 = vst [vmem:[%s672_s2] sm:$0xff] %v443_v27   ;;  %v321_v32 = vadd.f32 %v521_v16, %v320_v28  ;;  %v357_v33 = vadd.f32 %v342_v29, %v341_v22  ;;  %483 = vst [vmem:[%s672_s2 + $0x20] sm:$0xff] %v463_v30  }
  0xfd   :  { %v358_v35 = vadd.f32 %v357_v33, %v343_v31  ;;  %v525_v36 = vpop.f32.mrb[4].mxu0  ;;  %v322_v37 = vadd.f32 %v522_v20, %v321_v32  ;;  %v533_v38 = vpop.f32.mrb[4].mxu1 }
  0xfe   :  { %v193_v39 = vpop.f32.mrb[5].mxu0  ;;  %v225_v40 = vpop.f32.mrb[5].mxu1  ;;  %v347_v55 = vmul.f32 %v525_v36, %v525_v36  ;;  %v355_v15 = vmul.f32 %v533_v38, %v533_v38 }
  0xff   :  { %v323_v41 = vadd.f32 %v322_v37, %v193_v39  ;;  %v345_v42 = vmul.f32 %v193_v39, %v193_v39  ;;  %v359_v43 = vadd.f32 %v358_v35, %v344_v34  ;;  %v526_v44 = vpop.f32.mrb[6].mxu0  ;;  %v534_v45 = vpop.f32.mrb[6].mxu1  ;;  %v353_v9 = vmul.f32 %v225_v40, %v225_v40 }
 0x100   :  { %v458_v46 = vpack.c.bf16 %v526_v44, %v525_v36  ;;  %v196_v47 = vpop.f32.mrb[7].mxu0  ;;  %v478_v48 = vpack.c.bf16 %v534_v45, %v533_v38  ;;  %v228_v49 = vpop.f32.mrb[7].mxu1  ;;  %v348_v58 = vmul.f32 %v526_v44, %v526_v44 }
 0x101   :  { %v360_v50 = vadd.f32 %v359_v43, %v345_v42  ;;  %v453_v51 = vpack.c.bf16 %v196_v47, %v193_v39  ;;  %v324_v52 = vadd.f32 %v323_v41, %v196_v47  ;;  %v346_v53 = vmul.f32 %v196_v47, %v196_v47 }
 0x102   :  { %482 = vst [vmem:[%s672_s2 + $0x18] sm:$0xff] %v458_v46   ;;  %486 = vst [vmem:[%s672_s2 + $0x38] sm:$0xff] %v478_v48   ;;  %v473_v54 = vpack.c.bf16 %v228_v49, %v225_v40  ;;  %v354_v14 = vmul.f32 %v228_v49, %v228_v49 }
 0x103   :  { %481 = vst [vmem:[%s672_s2 + $0x10] sm:$0xff] %v453_v51   ;;  %v325_v56 = vadd.f32 %v525_v36, %v324_v52  ;;  %v361_v57 = vadd.f32 %v360_v50, %v346_v53 }
 0x104   :  { %485 = vst [vmem:[%s672_s2 + $0x30] sm:$0xff] %v473_v54  }
 0x105   :  { %v362_v59 = vadd.f32 %v361_v57, %v347_v55  ;;  %v326_v60 = vadd.f32 %v526_v44, %v325_v56 }
 0x107   :  { %v327_v62 = vadd.f32 %v326_v60, %v209_v19  ;;  %v363_v63 = vadd.f32 %v362_v59, %v348_v58  ;;  %v356_v19 = vmul.f32 %v534_v45, %v534_v45 }
 0x109   :  { %v364_v0 = vadd.f32 %v363_v63, %v349_v61  ;;  %v328_v1 = vadd.f32 %v327_v62, %v212_v26 }
 0x10b   :  { %v329_v4 = vadd.f32 %v529_v17, %v328_v1  ;;  %v365_v5 = vadd.f32 %v364_v0, %v350_v2 }
 0x10d   :  { %v366_v7 = vadd.f32 %v365_v5, %v351_v3  ;;  %v330_v8 = vadd.f32 %v530_v21, %v329_v4 }
 0x10f   :  { %v331_v10 = vadd.f32 %v330_v8, %v225_v40  ;;  %v367_v11 = vadd.f32 %v366_v7, %v352_v6 }
 0x111   :  { %v368_v12 = vadd.f32 %v367_v11, %v353_v9  ;;  %v332_v13 = vadd.f32 %v331_v10, %v228_v49 }
 0x113   :  { %v333_v16 = vadd.f32 %v533_v38, %v332_v13  ;;  %v369_v18 = vadd.f32 %v368_v12, %v354_v14 }
 0x115   :  { %v334_v20 = vadd.f32 %v534_v45, %v333_v16  ;;  %v370_v22 = vadd.f32 %v369_v18, %v355_v15 }
 0x117   :  { %v335_v23 = vrot.slane %v334_v20, 4  ;;  %v371_v24 = vadd.f32 %v370_v22, %v356_v19 }
 0x119   :  { %v336_v25 = vadd.f32 %v335_v23, %v334_v20  ;;  %v372_v17 = vrot.slane %v371_v24, 4 }
 0x11b   :  { %v337_v26 = vrot.slane %v336_v25, 2  ;;  %v373_v27 = vadd.f32 %v372_v17, %v371_v24 }
 0x11d   :  { %v338_v28 = vadd.f32 %v337_v26, %v336_v25  ;;  %v374_v21 = vrot.slane %v373_v27, 2 }
 0x11f   :  { %v339_v29 = vrot.slane %v338_v28, 1  ;;  %v375_v30 = vadd.f32 %v374_v21, %v373_v27 }
 0x121   :  { %v340_v31 = vadd.f32 %v339_v29, %v338_v28  ;;  %v376_v32 = vrot.slane %v375_v30, 1 }
 0x123   :  { %v377_v33 = vadd.f32 %v376_v32, %v375_v30  ;;  %378 = vst [vmem:[%s673_s3] sm:$0x1] %v340_v31 }
 0x125   :  { %379 = vst [vmem:[%s674_s4] sm:$0x1] %v377_v33 }

// kernel: bottleneck_forward.6
= control target key start
LH: loop header
LB: loop body
LE: loop exit
PB: predicated region body
PF: predicated region fallthrough
CT: control target
= control target key end

     0   :  { %s791_s3 = inlined_call_operand.vmem [shape: bf16[128,128], index: 3, kind: input, shape index: {}]   ;;  %s792_s0 = inlined_call_operand.vmem [shape: bf16[128,128], index: 0, kind: input, shape index: {}]   ;;  %s793_s1 = inlined_call_operand.vmem [shape: f32[1,128], index: 1, kind: input, shape index: {}]   ;;  %s794_s2 = inlined_call_operand.vmem [shape: f32[1,128], index: 2, kind: input, shape index: {}]   ;;  %s795_s4 = inlined_call_operand.vmem [shape: bf16[128,128], index: 4, kind: output, shape index: {0}]   ;;  %s796_s5 = inlined_call_operand.vmem [shape: f32[1,1,128], index: 5, kind: output, shape index: {1}]   ;;  %s797_s6 = inlined_call_operand.vmem [shape: f32[1,1,128], index: 6, kind: output, shape index: {2}]  }
   0x1   :  { %v628_v0 = vld [vmem:[%s791_s3] sm:$0xff]   ;;  %v629_v1 = vld [vmem:[%s791_s3 + $0x8] sm:$0xff]   ;;  %v630_v2 = vld [vmem:[%s791_s3 + $0x10] sm:$0xff]  }
   0x2   :  { %580 = vmatprep.subr.bf16.mxu0 %v628_v0  ;;  %612 = vmatprep.subr.bf16.mxu1 %v628_v0  ;;  %v631_v3 = vld [vmem:[%s791_s3 + $0x18] sm:$0xff]   ;;  %v479_v4 = vld [vmem:[%s792_s0] sm:$0xff]   ;;  %v550_v8 = vld [vmem:[%s792_s0 + $0x8] sm:$0xff]  }
   0x3   :  { %581 = vmatpush3.bf16.msra.mxu0 %v628_v0  ;;  %620 = vmatpush3.bf16.msra.mxu1 %v628_v0  ;;  %v689_v5 = vld [vmem:[%s793_s1] ss:$0 sm:$0xff]  ;;  %v480_v6 = vunpack.c.l.bf16 %v479_v4  ;;  %v481_v7 = vunpack.c.h.bf16 %v479_v4  ;;  %v551_v9 = vld [vmem:[%s792_s0 + $0x10] sm:$0xff]   ;;  %v484_v11 = vunpack.c.l.bf16 %v550_v8  ;;  %v485_v14 = vunpack.c.h.bf16 %v550_v8  ;;  %v552_v22 = vld [vmem:[%s792_s0 + $0x18] sm:$0xff]  }
   0x4   :  { %582 = vmatprep.subr.bf16.mxu0 %v629_v1  ;;  %613 = vmatprep.subr.bf16.mxu1 %v629_v1  ;;  %v700_v10 = vld [vmem:[%s794_s2] ss:$0 sm:$0xff]  ;;  %v488_v17 = vunpack.c.l.bf16 %v551_v9  ;;  %v489_v21 = vunpack.c.h.bf16 %v551_v9  ;;  %v554_v27 = vld [vmem:[%s792_s0 + $0x28] sm:$0xff]   ;;  %v555_v30 = vld [vmem:[%s792_s0 + $0x30] sm:$0xff]   ;;  %v492_v32 = vunpack.c.l.bf16 %v552_v22  ;;  %v493_v33 = vunpack.c.h.bf16 %v552_v22 }
   0x5   :  { %v60_v12 = vmul.f32 %v480_v6, %v689_v5  ;;  %v61_v13 = vmul.f32 %v481_v7, %v689_v5  ;;  %v553_v15 = vld [vmem:[%s792_s0 + $0x20] sm:$0xff]   ;;  %v62_v20 = vmul.f32 %v484_v11, %v689_v5  ;;  %v63_v26 = vmul.f32 %v485_v14, %v689_v5  ;;  %v633_v28 = vld [vmem:[%s791_s3 + $0x28] sm:$0xff]   ;;  %v556_v39 = vld [vmem:[%s792_s0 + $0x38] sm:$0xff]  }
   0x6   :  { %v632_v16 = vld [vmem:[%s791_s3 + $0x20] sm:$0xff]   ;;  %v496_v23 = vunpack.c.l.bf16 %v553_v15  ;;  %v64_v29 = vmul.f32 %v488_v17, %v689_v5  ;;  %v497_v34 = vunpack.c.h.bf16 %v553_v15  ;;  %v65_v36 = vmul.f32 %v489_v21, %v689_v5  ;;  %v634_v44 = vld [vmem:[%s791_s3 + $0x30] sm:$0xff]   ;;  %v635_v61 = vld [vmem:[%s791_s3 + $0x38] sm:$0xff]  }
   0x7   :  { %583 = vmatpush3.bf16.msra.mxu0 %v629_v1  ;;  %621 = vmatpush3.bf16.msra.mxu1 %v629_v1  ;;  %v83_v18 = vadd.f32 %v700_v10, %v60_v12  ;;  %v84_v19 = vadd.f32 %v700_v10, %v61_v13  ;;  %v85_v35 = vadd.f32 %v700_v10, %v62_v20  ;;  %v500_v38 = vunpack.c.l.bf16 %v554_v27 }
   0x8   :  { %584 = vmatprep.subr.bf16.mxu0 %v630_v2  ;;  %614 = vmatprep.subr.bf16.mxu1 %v630_v2  ;;  %v68_v37 = vmul.f32 %v496_v23, %v689_v5  ;;  %v86_v40 = vadd.f32 %v700_v10, %v63_v26  ;;  %v69_v41 = vmul.f32 %v497_v34, %v689_v5  ;;  %v501_v42 = vunpack.c.h.bf16 %v554_v27 }
   0x9   :  { %v99_v24 = vmax.f32 %v83_v18, 0.0  ;;  %v100_v25 = vmax.f32 %v84_v19, 0.0  ;;  %v504_v43 = vunpack.c.l.bf16 %v555_v30  ;;  %v87_v45 = vadd.f32 %v700_v10, %v64_v29 }
   0xa   :  { %v91_v46 = vadd.f32 %v700_v10, %v68_v37  ;;  %v70_v47 = vmul.f32 %v500_v38, %v689_v5  ;;  %v505_v48 = vunpack.c.h.bf16 %v555_v30  ;;  %v92_v49 = vadd.f32 %v700_v10, %v69_v41 }
   0xb   :  { %585 = vmatpush3.bf16.msra.mxu0 %v630_v2  ;;  %622 = vmatpush3.bf16.msra.mxu1 %v630_v2  ;;  %v115_v31 = vpack.c.bf16 %v100_v25, %v99_v24  ;;  %v71_v50 = vmul.f32 %v501_v42, %v689_v5  ;;  %v72_v51 = vmul.f32 %v504_v43, %v689_v5  ;;  %v508_v52 = vunpack.c.l.bf16 %v556_v39 }
   0xc   :  { %586 = vmatprep.subr.bf16.mxu0 %v631_v3  ;;  %615 = vmatprep.subr.bf16.mxu1 %v631_v3  ;;  %v107_v53 = vmax.f32 %v91_v46, 0.0  ;;  %v93_v54 = vadd.f32 %v700_v10, %v70_v47  ;;  %v73_v55 = vmul.f32 %v505_v48, %v689_v5  ;;  %v509_v56 = vunpack.c.h.bf16 %v556_v39 }
   0xd   :  { %596 = vmatprep.mubr.bf16.mxu0 %v115_v31  ;;  %v88_v57 = vadd.f32 %v700_v10, %v65_v36  ;;  %v108_v58 = vmax.f32 %v92_v49, 0.0  ;;  %v94_v59 = vadd.f32 %v700_v10, %v71_v50  ;;  %v95_v60 = vadd.f32 %v700_v10, %v72_v51 }
   0xe   :  { %v66_v62 = vmul.f32 %v492_v32, %v689_v5  ;;  %v96_v63 = vadd.f32 %v700_v10, %v73_v55  ;;  %v101_v0 = vmax.f32 %v85_v35, 0.0  ;;  %v102_v1 = vmax.f32 %v86_v40, 0.0 }
   0xf   :  { %587 = vmatpush3.bf16.msra.mxu0 %v631_v3  ;;  %623 = vmatpush3.bf16.msra.mxu1 %v631_v3  ;;  %v67_v2 = vmul.f32 %v493_v33, %v689_v5  ;;  %v119_v3 = vpack.c.bf16 %v108_v58, %v107_v53  ;;  %v109_v4 = vmax.f32 %v93_v54, 0.0  ;;  %v110_v6 = vmax.f32 %v94_v59, 0.0 }
  0x10   :  { %588 = vmatprep.subr.bf16.mxu0 %v632_v16  ;;  %616 = vmatprep.subr.bf16.mxu1 %v632_v16  ;;  %v74_v7 = vmul.f32 %v508_v52, %v689_v5  ;;  %v75_v8 = vmul.f32 %v509_v56, %v689_v5  ;;  %v103_v9 = vmax.f32 %v87_v45, 0.0  ;;  %v104_v11 = vmax.f32 %v88_v57, 0.0 }
  0x11   :  { %v111_v12 = vmax.f32 %v95_v60, 0.0  ;;  %v112_v13 = vmax.f32 %v96_v63, 0.0  ;;  %v89_v14 = vadd.f32 %v700_v10, %v66_v62  ;;  %v90_v15 = vadd.f32 %v700_v10, %v67_v2  ;;  %604 = vmatprep.mubr.bf16.mxu1 %v119_v3 }
  0x12   :  { %v120_v17 = vpack.c.bf16 %v110_v6, %v109_v4  ;;  %v97_v18 = vadd.f32 %v700_v10, %v74_v7  ;;  %v98_v19 = vadd.f32 %v700_v10, %v75_v8  ;;  %v117_v5 = vpack.c.bf16 %v104_v11, %v103_v9 }
  0x13   :  { %589 = vmatpush3.bf16.msra.mxu0 %v632_v16  ;;  %624 = vmatpush3.bf16.msra.mxu1 %v632_v16  ;;  %v116_v16 = vpack.c.bf16 %v102_v1, %v101_v0  ;;  %v121_v20 = vpack.c.bf16 %v112_v13, %v111_v12  ;;  %v105_v21 = vmax.f32 %v89_v14, 0.0  ;;  %v106_v22 = vmax.f32 %v90_v15, 0.0 }
  0x14   :  { %590 = vmatprep.subr.bf16.mxu0 %v633_v28  ;;  %617 = vmatprep.subr.bf16.mxu1 %v633_v28  ;;  %v113_v23 = vmax.f32 %v97_v18, 0.0  ;;  %v114_v24 = vmax.f32 %v98_v19, 0.0 }
  0x15   :  { %v118_v25 = vpack.c.bf16 %v106_v22, %v105_v21 }
  0x16   :  { %v122_v26 = vpack.c.bf16 %v114_v24, %v113_v23 }
  0x17   :  { %591 = vmatpush3.bf16.msra.mxu0 %v633_v28  ;;  %625 = vmatpush3.bf16.msra.mxu1 %v633_v28 }
  0x18   :  { %592 = vmatprep.subr.bf16.mxu0 %v634_v44  ;;  %618 = vmatprep.subr.bf16.mxu1 %v634_v44 }
  0x1b   :  { %593 = vmatpush3.bf16.msra.mxu0 %v634_v44  ;;  %626 = vmatpush3.bf16.msra.mxu1 %v634_v44 }
  0x1c   :  { %594 = vmatprep.subr.bf16.mxu0 %v635_v61  ;;  %619 = vmatprep.subr.bf16.mxu1 %v635_v61 }
  0x1f   :  { %595 = vmatpush3.bf16.msra.mxu0 %v635_v61  ;;  %627 = vmatpush3.bf16.msra.mxu1 %v635_v61 }
  0x22   :  { %597 = vmatmul.mubr.bf16.vlgmr.msra.gmra.mrb[0].mxu0 %v116_v16  ;;  %605 = vmatmul.mubr.bf16.vlgmr.msra.gmra.mrb[0].mxu1 %v120_v17 }
  0x23   :  { %600 = vmatprep.mubr.bf16.mxu0 %v117_v5  ;;  %608 = vmatprep.mubr.bf16.mxu1 %v121_v20 }
  0x2a   :  { %601 = vmatmul.mubr.bf16.gmra.mrb[4].mxu0 %v118_v25  ;;  %609 = vmatmul.mubr.bf16.gmra.mrb[4].mxu1 %v122_v26 }
  0xf5   :  { %v598_v27 = vpop.f32.mrb[0].mxu0  ;;  %v606_v28 = vpop.f32.mrb[0].mxu1 }
  0xf6   :  { %v221_v29 = vpop.f32.mrb[1].mxu0  ;;  %v253_v10 = vpop.f32.mrb[1].mxu1  ;;  %v387_v41 = vmul.f32 %v598_v27, %v598_v27  ;;  %v395_v15 = vmul.f32 %v606_v28, %v606_v28 }
  0xf7   :  { %v599_v30 = vpop.f32.mrb[2].mxu0  ;;  %v607_v31 = vpop.f32.mrb[2].mxu1  ;;  %v385_v32 = vmul.f32 %v221_v29, %v221_v29  ;;  %v393_v8 = vmul.f32 %v253_v10, %v253_v10 }
  0xf8   :  { %v518_v33 = vpack.c.bf16 %v599_v30, %v598_v27  ;;  %v224_v34 = vpop.f32.mrb[3].mxu0  ;;  %v538_v35 = vpack.c.bf16 %v607_v31, %v606_v28  ;;  %v256_v36 = vpop.f32.mrb[3].mxu1  ;;  %v388_v44 = vmul.f32 %v599_v30, %v599_v30  ;;  %v396_v18 = vmul.f32 %v607_v31, %v607_v31 }
  0xf9   :  { %v513_v37 = vpack.c.bf16 %v224_v34, %v221_v29  ;;  %v364_v38 = vadd.f32 %v224_v34, %v221_v29  ;;  %v386_v39 = vmul.f32 %v224_v34, %v224_v34  ;;  %v533_v40 = vpack.c.bf16 %v256_v36, %v253_v10 }
  0xfa   :  { %557 = vst [vmem:[%s795_s4 + $0x8] sm:$0xff] %v518_v33   ;;  %561 = vst [vmem:[%s795_s4 + $0x28] sm:$0xff] %v538_v35   ;;  %v394_v14 = vmul.f32 %v256_v36, %v256_v36 }
  0xfb   :  { %514 = vst [vmem:[%s795_s4] sm:$0xff] %v513_v37   ;;  %v365_v42 = vadd.f32 %v598_v27, %v364_v38  ;;  %v401_v43 = vadd.f32 %v386_v39, %v385_v32  ;;  %560 = vst [vmem:[%s795_s4 + $0x20] sm:$0xff] %v533_v40  }
  0xfd   :  { %v402_v45 = vadd.f32 %v401_v43, %v387_v41  ;;  %v602_v46 = vpop.f32.mrb[4].mxu0  ;;  %v366_v47 = vadd.f32 %v599_v30, %v365_v42  ;;  %v610_v48 = vpop.f32.mrb[4].mxu1 }
  0xfe   :  { %v237_v49 = vpop.f32.mrb[5].mxu0  ;;  %v269_v50 = vpop.f32.mrb[5].mxu1  ;;  %v391_v1 = vmul.f32 %v602_v46, %v602_v46  ;;  %v399_v26 = vmul.f32 %v610_v48, %v610_v48 }
  0xff   :  { %v367_v51 = vadd.f32 %v366_v47, %v237_v49  ;;  %v389_v52 = vmul.f32 %v237_v49, %v237_v49  ;;  %v403_v53 = vadd.f32 %v402_v45, %v388_v44  ;;  %v603_v54 = vpop.f32.mrb[6].mxu0  ;;  %v611_v55 = vpop.f32.mrb[6].mxu1  ;;  %v397_v20 = vmul.f32 %v269_v50, %v269_v50 }
 0x100   :  { %v528_v56 = vpack.c.bf16 %v603_v54, %v602_v46  ;;  %v240_v57 = vpop.f32.mrb[7].mxu0  ;;  %v548_v58 = vpack.c.bf16 %v611_v55, %v610_v48  ;;  %v272_v59 = vpop.f32.mrb[7].mxu1  ;;  %v392_v4 = vmul.f32 %v603_v54, %v603_v54 }
 0x101   :  { %v404_v60 = vadd.f32 %v403_v53, %v389_v52  ;;  %v523_v61 = vpack.c.bf16 %v240_v57, %v237_v49  ;;  %v368_v62 = vadd.f32 %v367_v51, %v240_v57  ;;  %v390_v63 = vmul.f32 %v240_v57, %v240_v57 }
 0x102   :  { %559 = vst [vmem:[%s795_s4 + $0x18] sm:$0xff] %v528_v56   ;;  %563 = vst [vmem:[%s795_s4 + $0x38] sm:$0xff] %v548_v58   ;;  %v543_v0 = vpack.c.bf16 %v272_v59, %v269_v50  ;;  %v398_v25 = vmul.f32 %v272_v59, %v272_v59 }
 0x103   :  { %558 = vst [vmem:[%s795_s4 + $0x10] sm:$0xff] %v523_v61   ;;  %v369_v2 = vadd.f32 %v602_v46, %v368_v62  ;;  %v405_v3 = vadd.f32 %v404_v60, %v390_v63 }
 0x104   :  { %562 = vst [vmem:[%s795_s4 + $0x30] sm:$0xff] %v543_v0  }
 0x105   :  { %v406_v6 = vadd.f32 %v405_v3, %v391_v1  ;;  %v370_v7 = vadd.f32 %v603_v54, %v369_v2 }
 0x107   :  { %v371_v9 = vadd.f32 %v370_v7, %v253_v10  ;;  %v407_v11 = vadd.f32 %v406_v6, %v392_v4  ;;  %v400_v10 = vmul.f32 %v611_v55, %v611_v55 }
 0x109   :  { %v408_v12 = vadd.f32 %v407_v11, %v393_v8  ;;  %v372_v13 = vadd.f32 %v371_v9, %v256_v36 }
 0x10b   :  { %v373_v16 = vadd.f32 %v606_v28, %v372_v13  ;;  %v409_v17 = vadd.f32 %v408_v12, %v394_v14 }
 0x10d   :  { %v410_v19 = vadd.f32 %v409_v17, %v395_v15  ;;  %v374_v5 = vadd.f32 %v607_v31, %v373_v16 }
 0x10f   :  { %v375_v21 = vadd.f32 %v374_v5, %v269_v50  ;;  %v411_v22 = vadd.f32 %v410_v19, %v396_v18 }
 0x111   :  { %v412_v23 = vadd.f32 %v411_v22, %v397_v20  ;;  %v376_v24 = vadd.f32 %v375_v21, %v272_v59 }
 0x113   :  { %v377_v27 = vadd.f32 %v610_v48, %v376_v24  ;;  %v413_v29 = vadd.f32 %v412_v23, %v398_v25 }
 0x115   :  { %v378_v30 = vadd.f32 %v611_v55, %v377_v27  ;;  %v414_v32 = vadd.f32 %v413_v29, %v399_v26 }
 0x117   :  { %v379_v33 = vrot.slane %v378_v30, 4  ;;  %v415_v34 = vadd.f32 %v414_v32, %v400_v10 }
 0x119   :  { %v380_v35 = vadd.f32 %v379_v33, %v378_v30  ;;  %v416_v28 = vrot.slane %v415_v34, 4 }
 0x11b   :  { %v381_v36 = vrot.slane %v380_v35, 2  ;;  %v417_v37 = vadd.f32 %v416_v28, %v415_v34 }
 0x11d   :  { %v382_v38 = vadd.f32 %v381_v36, %v380_v35  ;;  %v418_v31 = vrot.slane %v417_v37, 2 }
 0x11f   :  { %v383_v39 = vrot.slane %v382_v38, 1  ;;  %v419_v40 = vadd.f32 %v418_v31, %v417_v37 }
 0x121   :  { %v384_v41 = vadd.f32 %v383_v39, %v382_v38  ;;  %v420_v42 = vrot.slane %v419_v40, 1 }
 0x123   :  { %v421_v43 = vadd.f32 %v420_v42, %v419_v40  ;;  %422 = vst [vmem:[%s796_s5] sm:$0x1] %v384_v41 }
 0x125   :  { %423 = vst [vmem:[%s797_s6] sm:$0x1] %v421_v43 }

// kernel: bottleneck_forward.5
= control target key start
LH: loop header
LB: loop body
LE: loop exit
PB: predicated region body
PF: predicated region fallthrough
CT: control target
= control target key end

     0   :  { %s2606_s24 = smov 0   ;;  %s2608_s25 = smov 0   ;;  %s3045_s0 = inlined_call_operand.vmem [shape: bf16[2,8,8,128], index: 0, kind: input, shape index: {}, may-alias: {0,1}]   ;;  %s3046_s1 = inlined_call_operand.vmem [shape: bf16[2,8,8,128], index: 1, kind: input, shape index: {}, may-alias: {0,1}]   ;;  %s3047_s2 = inlined_call_operand.vmem [shape: f32[1,128], index: 2, kind: input, shape index: {}]   ;;  %s3048_s3 = inlined_call_operand.vmem [shape: f32[1,128], index: 3, kind: input, shape index: {}]   ;;  %s3049_s4 = inlined_call_operand.vmem [shape: bf16[1152,128], index: 4, kind: input, shape index: {}]   ;;  %s3050_s5 = inlined_call_operand.vmem [shape: bf16[2,8,8,128], index: 5, kind: output, shape index: {0}]   ;;  %s3051_s6 = inlined_call_operand.vmem [shape: f32[4,1,128], index: 6, kind: output, shape index: {1}]   ;;  %s3052_s7 = inlined_call_operand.vmem [shape: f32[4,1,128], index: 7, kind: output, shape index: {2}]  }
   0x1   :  { %3053 = sst [smem:[#allocation10_spill]] %s3045_s0  ;;  %s2610_s26 = smov 0  }
   0x2   :  { %3054 = sst [smem:[#allocation11_spill]] %s3050_s5  ;;  %s2612_s27 = smov 0  }
   0x3   :  { %s2614_s28 = smov 0  }
   0x4 LB: > { %s27_s29 = sadd.s32 1, %s2556_s26  ;;  %s30_s30 = sadd.s32 1, %s2560_s27  ;;  %s2564_s28 = sphi %s2614_s28, %s18_s28   ;;  %s2560_s27 = sphi %s2612_s27, %s3071_s27   ;;  %s2556_s26 = sphi %s2610_s26, %s3070_s26   ;;  %s2552_s25 = sphi %s2608_s25, %s3069_s25   ;;  %s2548_s24 = sphi %s2606_s24, %s3068_s24  }
   0x5   : > { %p28_p0 = scmp.ge.s32.totalorder %s27_s29, 2  ;;  %p2116_p1 = scmp.ge.s32.totalorder %s2564_s28, 1 }
   0x6   : > { %p247_p2 = scmp.lt.s32.totalorder %s2564_s28, 5 }
   0x7   : > { %s3073_s29 = smov (%p28_p0, %s27_s29), 0  ;;  %s3075_s30 = smov (!%p28_p0, %s30_s30), %s2560_s27 }
   0x8   : > { %p248_p3 = pnand %p2116_p1, %p247_p2  ;;  %p32_p4 = scmp.ge.s32.totalorder %s3075_s30, 2 }
   0x9   : > { %s2117_s8 = sshll.u32 (!%p248_p3), %s2548_s24, 2  ;;  %p296_p5 = scmp.lt.s32.totalorder (!%p248_p3), %s2552_s25, 1 }
   0xa   : > { %s3077_s30 = smov (%p32_p4, %s3075_s30), 0  ;;  %251 = sbr.rel (%p248_p3) target bundleno = 401 (0x191), region = 36 }
   0xb   : > { %p298_p6 = scmp.lt.s32.totalorder (!%p248_p3), %s2117_s8, 7  ;;  %s2123_s9 = sshll.u32 (!%p248_p3), %s2552_s25, 1 }
   0xc   : > { %s316_s13 = sadd.s32 (!%p248_p3), %s2548_s24, %s2123_s9  ;;  %s2126_s16 = sadd.s32 (!%p248_p3), 4294967295, %s2117_s8 }
   0xd   : > { %p317_p7 = scmp.lt.s32.totalorder (!%p248_p3), %s316_s13, 3  ;;  %s3055_s0 = sld [smem:[#allocation10_spill]] (!%p248_p3) }
   0xe   : > { %s3056_s5 = sld [smem:[#allocation11_spill]] (!%p248_p3)  ;;  %p332_p8 = scmp.gt.s32.totalorder (!%p248_p3), %s2126_s16, 0 }
   0xf   : > { %s334_s23 = sadd.s32 (!%p248_p3), 4, %s2117_s8  ;;  %s2127_s18 = sshll.u32 (!%p248_p3), %s2552_s25, 3 }
  0x10   : > { %p335_p9 = scmp.lt.s32.totalorder (!%p248_p3), %s334_s23, 7 }
  0x11   : > { %s297_s10 = scalar_select %p296_p5, %s2552_s25, 1 }
  0x12   : > { %s299_s11 = scalar_select %p298_p6, %s2117_s8, 7 }
  0x13   : > { %s2118_s12 = sshll.u32 %s297_s10, 3  ;;  %s3079_s13 = smov (!%p317_p7, %s316_s13), 3 }
  0x14   : > { %s301_s14 = sadd.s32 %s2118_s12, %s299_s11  ;;  %s326_s17 = scalar_lea.vmem %s3052_s7, %s3079_s13 }
  0x15   : > { %s2119_s15 = sshll.u32 %s301_s14, 2  ;;  %s3081_s16 = smov (!%p332_p8, %s2126_s16), 0 }
  0x16   : > { %s2648_s19 = scalar_lea.vmem %s3055_s0, %s2119_s15  ;;  %s2653_s22 = scalar_lea.vmem %s3056_s5, %s2119_s15 }
  0x17   : > { %s338_s20 = sadd.s32 %s2127_s18, %s3081_s16  ;;  %s3083_s23 = smov (!%p335_p9, %s334_s23), 7 }
  0x18   : > { %s2128_s15 = sshll.u32 %s338_s20, 2 }
  0x19   : > { %s340_s5 = scalar_lea.vmem %s3046_s1, %s2128_s15 }
  0x1a   : > { %v358_v0 = vld [vmem:[%s340_s5] sm:$0xf] }
  0x1b   : > { %359 = vst [vmem:[#allocation4] sm:$0xf] %v358_v0 }
  0x1c   : > { %384 = vsyncadd [#allocation5], 64  ;;  %s385_s8 = sadd.s32 %s2127_s18, %s3083_s23 }
  0x1d   : > { %s2129_s9 = sshll.u32 %s385_s8, 2 }
  0x1e   : > { %s387_s12 = scalar_lea.vmem %s3046_s1, %s2129_s9 }
  0x1f   : > { %v407_v1 = vld [vmem:[%s387_s12] sm:$0xf] }
  0x20   : > { %408 = vst [vmem:[#allocation4 + $0x4] sm:$0xf] %v407_v1 }
  0x21   : > { %433 = vsyncadd [#allocation5 + $0x1], 64  ;;  %vm436_vm0 = vcmask 1043459   ;;  %vm437_vm1 = vsmask.f32 7950  ;;  %vm457_vm2 = vcmask 1040384  }
  0x22   : > { %vm2672_vm3 = vmand %vm436_vm0, %vm437_vm1  ;;  %v439_v3 = vld [vmem:[#allocation2] sm:$0x8]  ;;  %v442_v4 = vld [vmem:[#allocation2 + $0xc] sm:$0x8]  ;;  %vm458_vm4 = vsmask.f32 256 }
  0x23   : > { %v440_v5 = vsel %vm2672_vm3, 0, %v439_v3  ;;  %v443_v6 = vsel %vm2672_vm3, 0, %v442_v4  ;;  %v445_v7 = vld [vmem:[#allocation2 + $0x18] sm:$0x8]  ;;  %v448_v8 = vld [vmem:[#allocation2 + $0x24] sm:$0x8]  ;;  %vm2681_vm5 = vmand %vm457_vm2, %vm458_vm4 }
  0x24   : > { %441 = vst [vmem:[#allocation2] sm:$0x8] %v440_v5  ;;  %444 = vst [vmem:[#allocation2 + $0xc] sm:$0x8] %v443_v6  ;;  %v446_v10 = vsel %vm2672_vm3, 0, %v445_v7  ;;  %v449_v11 = vsel %vm2672_vm3, 0, %v448_v8 }
  0x25   : > { %v451_v12 = vld [vmem:[#allocation2 + $0x30] sm:$0x8]  ;;  %v454_v13 = vld [vmem:[#allocation2 + $0x3c] sm:$0x8]  ;;  %447 = vst [vmem:[#allocation2 + $0x18] sm:$0x8] %v446_v10 }
  0x26   : > { %450 = vst [vmem:[#allocation2 + $0x24] sm:$0x8] %v449_v11  ;;  %v452_v14 = vsel %vm2672_vm3, 0, %v451_v12  ;;  %v455_v15 = vsel %vm2672_vm3, 0, %v454_v13  ;;  %v460_v16 = vld [vmem:[#allocation2 + $0x8] sm:$0x1] }
  0x27   : > { %v463_v17 = vld [vmem:[#allocation2 + $0x14] sm:$0x1]  ;;  %453 = vst [vmem:[#allocation2 + $0x30] sm:$0x8] %v452_v14  ;;  %456 = vst [vmem:[#allocation2 + $0x3c] sm:$0x8] %v455_v15 }
  0x28   : > { %v461_v18 = vsel %vm2681_vm5, 0, %v460_v16  ;;  %v464_v19 = vsel %vm2681_vm5, 0, %v463_v17  ;;  %v466_v20 = vld [vmem:[#allocation2 + $0x20] sm:$0x1]  ;;  %v469_v21 = vld [vmem:[#allocation2 + $0x2c] sm:$0x1] }
  0x29   : > { %462 = vst [vmem:[#allocation2 + $0x8] sm:$0x1] %v461_v18  ;;  %465 = vst [vmem:[#allocation2 + $0x14] sm:$0x1] %v464_v19  ;;  %v467_v22 = vsel %vm2681_vm5, 0, %v466_v20  ;;  %v470_v23 = vsel %vm2681_vm5, 0, %v469_v21 }
  0x2a   : > { %v472_v24 = vld [vmem:[#allocation2 + $0x38] sm:$0x1]  ;;  %v475_v25 = vld [vmem:[#allocation2 + $0x44] sm:$0x1]  ;;  %468 = vst [vmem:[#allocation2 + $0x20] sm:$0x1] %v467_v22 }
  0x2b   : > { %471 = vst [vmem:[#allocation2 + $0x2c] sm:$0x1] %v470_v23  ;;  %v473_v26 = vsel %vm2681_vm5, 0, %v472_v24  ;;  %v476_v27 = vsel %vm2681_vm5, 0, %v475_v25  ;;  %v2708_v28 = vld [vmem:[%s3047_s2] ss:$0 sm:$0xff] }
  0x2c   : > { %474 = vst [vmem:[#allocation2 + $0x38] sm:$0x1] %v473_v26  ;;  %477 = vst [vmem:[#allocation2 + $0x44] sm:$0x1] %v476_v27  ;;  %v2239_v29 = vld [vmem:[%s2648_s19] sm:$0xff]   ;;  %v2260_v30 = vld [vmem:[%s2648_s19 + $0x8] sm:$0xff]  }
  0x2d   : > { %v2240_v31 = vunpack.c.l.bf16 %v2239_v29  ;;  %v2241_v32 = vunpack.c.h.bf16 %v2239_v29  ;;  %v2244_v33 = vunpack.c.l.bf16 %v2260_v30  ;;  %v2245_v34 = vunpack.c.h.bf16 %v2260_v30  ;;  %v2715_v35 = vld [vmem:[%s3048_s3] ss:$0 sm:$0xff] }
  0x2f   : > { %v492_v36 = vmul.f32 %v2240_v31, %v2708_v28  ;;  %v493_v37 = vmul.f32 %v2241_v32, %v2708_v28  ;;  %v494_v38 = vmul.f32 %v2244_v33, %v2708_v28  ;;  %v495_v39 = vmul.f32 %v2245_v34, %v2708_v28 }
  0x31   : > { %v502_v40 = vadd.f32 %v2715_v35, %v492_v36  ;;  %v503_v41 = vadd.f32 %v2715_v35, %v493_v37  ;;  %v504_v42 = vadd.f32 %v2715_v35, %v494_v38  ;;  %v505_v43 = vadd.f32 %v2715_v35, %v495_v39 }
  0x33   : > { %v506_v44 = vmax.f32 %v502_v40, 0.0  ;;  %v507_v45 = vmax.f32 %v503_v41, 0.0  ;;  %v508_v46 = vmax.f32 %v504_v42, 0.0  ;;  %v509_v47 = vmax.f32 %v505_v43, 0.0 }
  0x35   : > { %v510_v48 = vpack.c.bf16 %v506_v44, %v506_v44  ;;  %v511_v49 = vpack.c.bf16 %v507_v45, %v507_v45  ;;  %v512_v50 = vpack.c.bf16 %v508_v46, %v508_v46  ;;  %v513_v51 = vpack.c.bf16 %v509_v47, %v509_v47 }
  0x37   : > { %515 = vst [vmem:[#allocation2 + $0x10] sm:$0xf] %v510_v48  ;;  %516 = vst [vmem:[#allocation2 + $0x1c] sm:$0xf] %v511_v49 }
  0x38   : > { %517 = vst [vmem:[#allocation2 + $0x28] sm:$0xf] %v512_v50  ;;  %518 = vst [vmem:[#allocation2 + $0x34] sm:$0xf] %v513_v51 }
  0x39   : > { %2542 = dma.done.wait [#allocation5], 64 }
  0x3a   : > { %2543 = vsyncadd [#allocation5], 4294967232 }
  0x3b   : > { %2544 = dma.done.wait [#allocation5 + $0x1], 64 }
  0x3c   : > { %2545 = vsyncadd [#allocation5 + $0x1], 4294967232  ;;  %p536_p10 = scmp.gt.s32.totalorder %s2548_s24, 0  ;;  %v2444_v52 = vld [vmem:[%s3049_s4 + $0x40] sm:$0xff]   ;;  %v2448_v56 = vld [vmem:[%s3049_s4 + $0x48] sm:$0xff]   ;;  %p543_p11 = scmp.lt.s32.totalorder %s2548_s24, 1 }
  0x3d   : > { %v2445_v53 = vld [vmem:[%s3049_s4 + $0xc0] sm:$0xff]   ;;  %2262 = vmatprep.subr.bf16.mxu0 %v2444_v52  ;;  %v2449_v57 = vld [vmem:[%s3049_s4 + $0xc8] sm:$0xff]   ;;  %v2452_v60 = vld [vmem:[%s3049_s4 + $0x50] sm:$0xff]   ;;  %vm559_vm6 = vsmask.f32 4368  ;;  %s3067_s11 = scalar_lea.vmem %s3051_s6, %s3079_s13 }
  0x3e   : > { %s2726_s19 = scalar_select %p536_p10, 1, 0  ;;  %v2446_v54 = vld [vmem:[%s3049_s4] sm:$0xff]   ;;  %2290 = vmatprep.subr.bf16.mxu1 %v2445_v53  ;;  %v2450_v58 = vld [vmem:[%s3049_s4 + $0x8] sm:$0xff]   ;;  %v2453_v61 = vld [vmem:[%s3049_s4 + $0xd0] sm:$0xff]  }
  0x3f   : > { %v2447_v55 = vld [vmem:[%s3049_s4 + $0x80] sm:$0xff]   ;;  %2263 = vmatpush3.bf16.msra.mxu0 %v2446_v54  ;;  %v2451_v59 = vld [vmem:[%s3049_s4 + $0x88] sm:$0xff]   ;;  %v2454_v62 = vld [vmem:[%s3049_s4 + $0x10] sm:$0xff]   ;;  %s544_s20 = scalar_select %p543_p11, 1, 0 }
  0x40   : > { %2291 = vmatpush3.bf16.msra.mxu1 %v2447_v55  ;;  %2264 = vmatprep.subr.bf16.mxu0 %v2448_v56  ;;  %v2455_v63 = vld [vmem:[%s3049_s4 + $0x90] sm:$0xff]   ;;  %v2456_v0 = vld [vmem:[%s3049_s4 + $0x58] sm:$0xff]   ;;  %v2460_v4 = vld [vmem:[%s3049_s4 + $0x60] sm:$0xff]   ;;  %v538_v23 = vstv %s2726_s19  ;;  %vm649_vm10 = vsmask.f32 3328 }
  0x41   : > { %2292 = vmatprep.subr.bf16.mxu1 %v2449_v57  ;;  %v2457_v1 = vld [vmem:[%s3049_s4 + $0xd8] sm:$0xff]   ;;  %v2461_v5 = vld [vmem:[%s3049_s4 + $0xe0] sm:$0xff]   ;;  %v2464_v8 = vld [vmem:[%s3049_s4 + $0x68] sm:$0xff]   ;;  %vm539_vm8 = vcmp.eq.s32.totalorder %v538_v23, 1  ;;  %v545_v46 = vstv %s544_s20  ;;  %vm650_vm11 = vsmask.f32 7440 }
  0x42   : > { %v2458_v2 = vld [vmem:[%s3049_s4 + $0x18] sm:$0xff]   ;;  %v2462_v6 = vld [vmem:[%s3049_s4 + $0x20] sm:$0xff]   ;;  %v2465_v9 = vld [vmem:[%s3049_s4 + $0xe8] sm:$0xff]   ;;  %vm2847_vm9 = vcmp.eq.s32.totalorder %v545_v46, 1 }
  0x43   : > { %2265 = vmatpush3.bf16.msra.mxu0 %v2450_v58  ;;  %v2459_v3 = vld [vmem:[%s3049_s4 + $0x98] sm:$0xff]   ;;  %v2463_v7 = vld [vmem:[%s3049_s4 + $0xa0] sm:$0xff]   ;;  %v2466_v10 = vld [vmem:[%s3049_s4 + $0x28] sm:$0xff]  }
  0x44   : > { %2293 = vmatpush3.bf16.msra.mxu1 %v2451_v59  ;;  %2266 = vmatprep.subr.bf16.mxu0 %v2452_v60  ;;  %v2467_v11 = vld [vmem:[%s3049_s4 + $0xa8] sm:$0xff]   ;;  %v2468_v12 = vld [vmem:[%s3049_s4 + $0x70] sm:$0xff]   ;;  %v2472_v16 = vld [vmem:[%s3049_s4 + $0x78] sm:$0xff]  }
  0x45   : > { %2294 = vmatprep.subr.bf16.mxu1 %v2453_v61  ;;  %v2469_v13 = vld [vmem:[%s3049_s4 + $0xf0] sm:$0xff]   ;;  %v2473_v17 = vld [vmem:[%s3049_s4 + $0xf8] sm:$0xff]   ;;  %v2247_v20 = vld [vmem:[#allocation4] sm:$0xff]  }
  0x46   : > { %v2470_v14 = vld [vmem:[%s3049_s4 + $0x30] sm:$0xff]   ;;  %v2474_v18 = vld [vmem:[%s3049_s4 + $0x38] sm:$0xff]   ;;  %v718_v21 = vld [vmem:[#allocation2 + $0xc] sm:$0x8]  ;;  %v2248_v22 = vunpack.c.l.bf16 %v2247_v20  ;;  %v2249_v32 = vunpack.c.h.bf16 %v2247_v20 }
  0x47   : > { %2267 = vmatpush3.bf16.msra.mxu0 %v2454_v62  ;;  %v2471_v15 = vld [vmem:[%s3049_s4 + $0xb0] sm:$0xff]   ;;  %v2475_v19 = vld [vmem:[%s3049_s4 + $0xb8] sm:$0xff]   ;;  %v727_v27 = vshrl.u32 %v718_v21, 16  ;;  %vm2832_vm7 = vmor %vm458_vm4, %vm559_vm6 }
  0x48   : > { %2295 = vmatpush3.bf16.msra.mxu1 %v2455_v63  ;;  %2268 = vmatprep.subr.bf16.mxu0 %v2456_v0  ;;  %v719_v24 = vld [vmem:[#allocation2 + $0x10] sm:$0xf]  ;;  %v720_v25 = vld [vmem:[#allocation2 + $0x18] sm:$0x8]  ;;  %v721_v26 = vld [vmem:[#allocation2 + $0x1c] sm:$0xf]  ;;  %v530_v33 = vmul.f32 %v2248_v22, %v2708_v28  ;;  %v531_v47 = vmul.f32 %v2249_v32, %v2708_v28 }
  0x49   : > { %2296 = vmatprep.subr.bf16.mxu1 %v2457_v1  ;;  %v732_v29 = vshrl.u32 %v719_v24, 16  ;;  %v735_v30 = vshll.u32 %v719_v24, 16  ;;  %v740_v31 = vshrl.u32 %v720_v25, 16  ;;  %v745_v34 = vshrl.u32 %v721_v26, 16  ;;  %v2477_v43 = vld [vmem:[%s3049_s4 + $0x140] sm:$0xff]   ;;  %vm2858_vm12 = vmor %vm649_vm10, %vm650_vm11  ;;  %v2485_v46 = vld [vmem:[%s3049_s4 + $0x150] sm:$0xff]  }
  0x4a   : > { %v748_v36 = vshll.u32 %v721_v26, 16  ;;  %v2142_v37 = vrot.slane %v727_v27, 11  ;;  %v532_v39 = vadd.f32 %v2715_v35, %v530_v33  ;;  %v551_v45 = vld [vmem:[#allocation2] sm:$0x8]  ;;  %v643_v50 = vld [vmem:[#allocation2 + $0x10] sm:$0xf]  ;;  %v533_v63 = vadd.f32 %v2715_v35, %v531_v47 }
  0x4b   : > { %2269 = vmatpush3.bf16.msra.mxu0 %v2458_v2  ;;  %v734_v38 = vrot.slane %v732_v29, 7  ;;  %v2143_v41 = vrot.slane %v740_v31, 11  ;;  %v747_v42 = vrot.slane %v745_v34, 7  ;;  %v2479_v51 = vld [vmem:[%s3049_s4 + $0x1c0] sm:$0xff]   ;;  %v553_v53 = vld [vmem:[#allocation2 + $0xc] sm:$0x8] }
  0x4c   : > { %2297 = vmatpush3.bf16.msra.mxu1 %v2459_v3  ;;  %2270 = vmatprep.subr.bf16.mxu0 %v2460_v4  ;;  %v534_v48 = vmax.f32 %v532_v39, 0.0  ;;  %v554_v54 = vld [vmem:[#allocation2 + $0x10] sm:$0xf]  ;;  %v667_v59 = vshrl.u32 %v643_v50, 16  ;;  %v670_v60 = vshll.u32 %v643_v50, 16  ;;  %v562_v61 = vshrl.u32 %v551_v45, 16 }
  0x4d   : > { %2298 = vmatprep.subr.bf16.mxu1 %v2461_v5  ;;  %v737_v44 = vor.u32 %v735_v30, %v734_v38  ;;  %v750_v49 = vor.u32 %v748_v36, %v747_v42  ;;  %v580_v62 = vshrl.u32 %v554_v54, 16  ;;  %v644_v0 = vld [vmem:[#allocation2 + $0x14] sm:$0x1]  ;;  %v575_v1 = vshrl.u32 %v553_v53, 16  ;;  %v2478_v34 = vld [vmem:[%s3049_s4 + $0x100] sm:$0xff]   ;;  %v2482_v42 = vld [vmem:[%s3049_s4 + $0x108] sm:$0xff]  }
  0x4e   : > { %v540_v55 = vsel %vm539_vm8, %v534_v48, 0.0  ;;  %v535_v2 = vmax.f32 %v533_v63, 0.0  ;;  %v669_v3 = vrot.slane %v667_v59, 4  ;;  %v672_v4 = vrot.slane %v670_v60, 5  ;;  %v2480_v39 = vld [vmem:[%s3049_s4 + $0x180] sm:$0xff]   ;;  %v2484_v47 = vld [vmem:[%s3049_s4 + $0x188] sm:$0xff]  }
  0x4f   : > { %2271 = vmatpush3.bf16.msra.mxu0 %v2462_v6  ;;  %v738_v52 = vsel %vm2832_vm7, %v2142_v37, %v737_v44  ;;  %v751_v56 = vsel %vm2832_vm7, %v2143_v41, %v750_v49  ;;  %v541_v57 = vpack.c.bf16 %v540_v55, %v540_v55  ;;  %v582_v6 = vrot.slane %v580_v62, 7  ;;  %v2481_v41 = vld [vmem:[%s3049_s4 + $0x148] sm:$0xff]   ;;  %v722_v49 = vld [vmem:[#allocation2 + $0x24] sm:$0x8]  ;;  %v2486_v28 = vld [vmem:[%s3049_s4 + $0x110] sm:$0xff]  }
  0x50   : > { %2299 = vmatpush3.bf16.msra.mxu1 %v2463_v7  ;;  %2272 = vmatprep.subr.bf16.mxu0 %v2464_v8  ;;  %v2146_v58 = vcombine.low %v738_v52, %v751_v56  ;;  %v547_v5 = vsel %vm2847_vm9, %v535_v2, 0.0  ;;  %v583_v7 = vshll.u32 %v554_v54, 16  ;;  %v642_v8 = vld [vmem:[#allocation2 + $0x8] sm:$0x1]  ;;  %v673_v35 = vor.u32 %v672_v4, %v669_v3  ;;  %v725_v52 = vld [vmem:[#allocation2 + $0x34] sm:$0xf] }
  0x51   : > { %2300 = vmatprep.subr.bf16.mxu1 %v2465_v9  ;;  %542 = vst [vmem:[#allocation2 + $0x4] sm:$0xf] %v541_v57  ;;  %v548_v9 = vpack.c.bf16 %v547_v5, %v547_v5  ;;  %v662_v21 = vshll.u32 %v642_v8, 16  ;;  %v2483_v44 = vld [vmem:[%s3049_s4 + $0x1c8] sm:$0xff]   ;;  %v753_v53 = vshrl.u32 %v722_v49, 16  ;;  %v2487_v57 = vld [vmem:[%s3049_s4 + $0x1d0] sm:$0xff]  }
  0x52   : > { %1718 = vmatprep.mubr.bf16.mxu1 %v2146_v58  ;;  %v674_v24 = vrot.slane %v673_v35, 4  ;;  %v2498_v48 = vld [vmem:[#allocation2 + $0x1c] ss:$12 sps:$4 sm:$0xff]   ;;  %v771_v58 = vshrl.u32 %v725_v52, 16  ;;  %v774_v59 = vshll.u32 %v725_v52, 16  ;;  %v2488_v60 = vld [vmem:[%s3049_s4 + $0x190] sm:$0xff]  }
  0x53   : > { %2273 = vmatpush3.bf16.msra.mxu0 %v2466_v10  ;;  %v676_v10 = vshll.u32 %v644_v0, 16  ;;  %550 = vst [vmem:[#allocation2 + $0x40] sm:$0xf] %v548_v9  ;;  %v664_v32 = vrot.slane %v662_v21, 5  ;;  %v723_v50 = vld [vmem:[#allocation2 + $0x28] sm:$0xf] }
  0x54   : > { %2301 = vmatpush3.bf16.msra.mxu1 %v2467_v11  ;;  %2274 = vmatprep.subr.bf16.mxu0 %v2468_v12  ;;  %v2132_v11 = vrot.slane %v562_v61, 11  ;;  %v2133_v12 = vrot.slane %v575_v1, 11  ;;  %v758_v54 = vshrl.u32 %v723_v50, 16  ;;  %v761_v55 = vshll.u32 %v723_v50, 16  ;;  %v2489_v61 = vld [vmem:[%s3049_s4 + $0x158] sm:$0xff]   ;;  %v2493_v35 = vld [vmem:[%s3049_s4 + $0x160] sm:$0xff]  }
  0x55   : > { %2302 = vmatprep.subr.bf16.mxu1 %v2469_v13  ;;  %v678_v22 = vrot.slane %v676_v10, 5  ;;  %v2144_v62 = vrot.slane %v753_v53, 11  ;;  %v555_v1 = vld [vmem:[#allocation2 + $0x18] sm:$0x8]  ;;  %v773_v3 = vrot.slane %v771_v58, 7  ;;  %v2500_v53 = vld [vmem:[%s3049_s4 + $0x1e8] sm:$0xff]  }
  0x56   : > { %v760_v63 = vrot.slane %v758_v54, 7  ;;  %v2490_v2 = vld [vmem:[%s3049_s4 + $0x118] sm:$0xff]   ;;  %v557_v5 = vld [vmem:[#allocation2 + $0x24] sm:$0x8]  ;;  %v558_v9 = vld [vmem:[#allocation2 + $0x28] sm:$0xf] }
  0x57   : > { %2275 = vmatpush3.bf16.msra.mxu0 %v2470_v14  ;;  %v679_v38 = vsel %vm2858_vm12, %v674_v24, %v678_v22  ;;  %v556_v4 = vld [vmem:[#allocation2 + $0x1c] sm:$0xf]  ;;  %v646_v22 = vld [vmem:[#allocation2 + $0x20] sm:$0x1] }
  0x58   : > { %2303 = vmatpush3.bf16.msra.mxu1 %v2471_v15  ;;  %2276 = vmatprep.subr.bf16.mxu0 %v2472_v16  ;;  %v2476_v13 = vld [vmem:[#allocation2 + $0x4] ss:$12 sps:$4 sm:$0xff]   ;;  %v763_v8 = vor.u32 %v761_v55, %v760_v63  ;;  %v593_v10 = vshrl.u32 %v556_v4, 16 }
  0x59   : > { %2304 = vmatprep.subr.bf16.mxu1 %v2473_v17  ;;  %v552_v14 = vld [vmem:[#allocation2 + $0x4] sm:$0xf]  ;;  %v585_v17 = vor.u32 %v583_v7, %v582_v6  ;;  %1669 = vmatprep.mubr.bf16.mxu0 %v2476_v13  ;;  %v588_v6 = vshrl.u32 %v555_v1, 16  ;;  %v2491_v7 = vld [vmem:[%s3049_s4 + $0x1d8] sm:$0xff]   ;;  %v776_v13 = vor.u32 %v774_v59, %v773_v3  ;;  %v2502_v55 = vld [vmem:[%s3049_s4 + $0x170] sm:$0xff]  }
  0x5a   : > { %v567_v15 = vshrl.u32 %v552_v14, 16  ;;  %v570_v16 = vshll.u32 %v552_v14, 16  ;;  %v2494_v24 = vld [vmem:[%s3049_s4 + $0x120] sm:$0xff]   ;;  %v807_v1 = vld [vmem:[#allocation2 + $0x14] sm:$0x1] }
  0x5b   : > { %2277 = vmatpush3.bf16.msra.mxu0 %v2474_v18  ;;  %v641_v18 = vld [vmem:[#allocation2 + $0x4] sm:$0xf]  ;;  %v586_v29 = vsel %vm2832_vm7, %v2133_v12, %v585_v17  ;;  %v601_v12 = vshrl.u32 %v557_v5, 16  ;;  %v2134_v14 = vrot.slane %v588_v6, 11  ;;  %v645_v17 = vld [vmem:[#allocation2 + $0x1c] sm:$0xf] }
  0x5c   : > { %2305 = vmatpush3.bf16.msra.mxu1 %v2475_v19  ;;  %2318 = vmatprep.subr.bf16.mxu0 %v2477_v43  ;;  %v653_v19 = vshrl.u32 %v641_v18, 16  ;;  %v656_v20 = vshll.u32 %v641_v18, 16  ;;  %v569_v23 = vrot.slane %v567_v15, 7  ;;  %v606_v15 = vshrl.u32 %v558_v9, 16  ;;  %v2492_v18 = vld [vmem:[%s3049_s4 + $0x198] sm:$0xff]  }
  0x5d   : > { %2346 = vmatprep.subr.bf16.mxu1 %v2479_v51  ;;  %v724_v51 = vld [vmem:[#allocation2 + $0x30] sm:$0x8]  ;;  %v2135_v21 = vrot.slane %v601_v12, 11  ;;  %v809_v5 = vld [vmem:[#allocation2 + $0x20] sm:$0x1] }
  0x5e   : > { %v655_v25 = vrot.slane %v653_v19, 4  ;;  %v658_v26 = vrot.slane %v656_v20, 5  ;;  %v572_v27 = vor.u32 %v570_v16, %v569_v23  ;;  %v766_v56 = vshrl.u32 %v724_v51, 16  ;;  %v647_v23 = vld [vmem:[#allocation2 + $0x28] sm:$0xf]  ;;  %v2505_v12 = vld [vmem:[%s3049_s4 + $0x1b0] sm:$0xff]  }
  0x5f   : > { %v609_v16 = vshll.u32 %v558_v9, 16  ;;  %v764_v19 = vsel %vm2832_vm7, %v2144_v62, %v763_v8  ;;  %v595_v20 = vrot.slane %v593_v10, 7  ;;  %v2504_v62 = vld [vmem:[%s3049_s4 + $0x1f0] sm:$0xff]   ;;  %v824_v8 = vshll.u32 %v807_v1, 16  ;;  %v975_v40 = vld [vmem:[#allocation2 + $0x40] sm:$0xf] }
  0x60   : > { %v659_v31 = vor.u32 %v658_v26, %v655_v25  ;;  %v573_v33 = vsel %vm2832_vm7, %v2132_v11, %v572_v27  ;;  %v2145_v0 = vrot.slane %v766_v56, 11  ;;  %v596_v11 = vshll.u32 %v556_v4, 16  ;;  %v648_v27 = vld [vmem:[#allocation2 + $0x2c] sm:$0x1]  ;;  %v2506_v4 = vld [vmem:[%s3049_s4 + $0x178] sm:$0xff]  }
  0x61   : > { %v2136_v36 = vcombine.low %v573_v33, %v586_v29  ;;  %v608_v26 = vrot.slane %v606_v15, 7  ;;  %v681_v29 = vshrl.u32 %v645_v17, 16  ;;  %v2508_v15 = vld [vmem:[%s3049_s4 + $0x1f8] sm:$0xff]  }
  0x62   : > { %v660_v37 = vrot.slane %v659_v31, 4  ;;  %v777_v25 = vsel %vm2832_vm7, %v2145_v0, %v776_v13  ;;  %v684_v31 = vshll.u32 %v645_v17, 16  ;;  %v598_v33 = vor.u32 %v596_v11, %v595_v20  ;;  %v806_v0 = vld [vmem:[#allocation2 + $0x10] sm:$0xf] }
  0x63   : > { %1670 = vmatmul.mubr.bf16.vlgmr.msra.gmra.mrb[0].mxu0 %v2136_v36  ;;  %v695_v36 = vshrl.u32 %v647_v23, 16  ;;  %v815_v6 = vshrl.u32 %v806_v0, 16  ;;  %v838_v11 = vshll.u32 %v809_v5, 16  ;;  %v826_v20 = vrot.slane %v824_v8, 5  ;;  %v2515_v5 = vld [vmem:[%s3049_s4 + $0x210] sm:$0xff]  }
  0x64   : > { %v665_v43 = vsel %vm2858_vm12, %v660_v37, %v664_v32  ;;  %2319 = vmatpush3.bf16.msra.mxu0 %v2478_v34  ;;  %1677 = vmatprep.mubr.bf16.mxu0 %v2498_v48  ;;  %v2147_v32 = vcombine.low %v764_v19, %v777_v25  ;;  %v690_v34 = vshll.u32 %v646_v22, 16  ;;  %v2495_v37 = vld [vmem:[%s3049_s4 + $0x1e0] sm:$0xff]   ;;  %v2499_v48 = vld [vmem:[%s3049_s4 + $0x128] sm:$0xff]  }
  0x65   : > { %v2140_v45 = vcombine.low %v665_v43, %v679_v38  ;;  %2320 = vmatprep.subr.bf16.mxu0 %v2481_v41  ;;  %v611_v38 = vor.u32 %v609_v16, %v608_v26  ;;  %v686_v41 = vrot.slane %v684_v31, 5  ;;  %v2496_v43 = vld [vmem:[%s3049_s4 + $0x1a0] sm:$0xff]   ;;  %v817_v13 = vrot.slane %v815_v6, 4  ;;  %v2512_v25 = vld [vmem:[#allocation2 + $0x1c] ss:$12 sps:$4 sm:$0xff]  }
  0x66   : > { %v692_v51 = vrot.slane %v690_v34, 5  ;;  %v881_v26 = vld [vmem:[#allocation2 + $0x18] sm:$0x8]  ;;  %v882_v31 = vld [vmem:[#allocation2 + $0x1c] sm:$0xf] }
  0x67   : > { %1719 = vmatmul.mubr.bf16.vlgmr.msra.gmra.mrb[0].mxu1 %v2140_v45  ;;  %v599_v45 = vsel %vm2832_vm7, %v2134_v14, %v598_v33  ;;  %v612_v49 = vsel %vm2832_vm7, %v2135_v21, %v611_v38  ;;  %v840_v21 = vrot.slane %v838_v11, 5  ;;  %v890_v33 = vshrl.u32 %v881_v26, 16  ;;  %v886_v11 = vld [vmem:[#allocation2 + $0x34] sm:$0xf] }
  0x68   : > { %2347 = vmatpush3.bf16.msra.mxu1 %v2480_v39  ;;  %2321 = vmatpush3.bf16.msra.mxu0 %v2482_v42  ;;  %v683_v39 = vrot.slane %v681_v29, 4  ;;  %v698_v42 = vshll.u32 %v647_v23, 16  ;;  %v2137_v54 = vcombine.low %v599_v45, %v612_v49  ;;  %v2510_v29 = vld [vmem:[#allocation2 + $0x10] ss:$12 sps:$4 sm:$0xff]   ;;  %v898_v38 = vshll.u32 %v882_v31, 16  ;;  %v2513_v45 = vld [vmem:[%s3049_s4 + $0x208] sm:$0xff]  }
  0x69   : > { %2348 = vmatprep.subr.bf16.mxu1 %v2483_v44  ;;  %2322 = vmatprep.subr.bf16.mxu0 %v2485_v46  ;;  %v2497_v44 = vld [vmem:[%s3049_s4 + $0x168] sm:$0xff]   ;;  %v697_v46 = vrot.slane %v695_v36, 4 }
  0x6a   : > { %1726 = vmatprep.mubr.bf16.mxu1 %v2147_v32  ;;  %v687_v50 = vor.u32 %v686_v41, %v683_v39  ;;  %v700_v52 = vrot.slane %v698_v42, 5  ;;  %v883_v32 = vld [vmem:[#allocation2 + $0x24] sm:$0x8]  ;;  %v884_v36 = vld [vmem:[#allocation2 + $0x28] sm:$0xf]  ;;  %v2152_v42 = vrot.slane %v890_v33, 11 }
  0x6b   : > { %1678 = vmatmul.mubr.bf16.gmra.mrb[4].mxu0 %v2137_v54  ;;  %v903_v39 = vshrl.u32 %v883_v32, 16  ;;  %v810_v49 = vld [vmem:[#allocation2 + $0x28] sm:$0xf] }
  0x6c   : > { %2349 = vmatpush3.bf16.msra.mxu1 %v2484_v47  ;;  %2323 = vmatpush3.bf16.msra.mxu0 %v2486_v28  ;;  %v704_v47 = vshll.u32 %v648_v27, 16  ;;  %v688_v56 = vrot.slane %v687_v50, 4  ;;  %v701_v28 = vor.u32 %v700_v52, %v697_v46  ;;  %v812_v52 = vld [vmem:[#allocation2 + $0x34] sm:$0xf] }
  0x6d   : > { %2350 = vmatprep.subr.bf16.mxu1 %v2487_v57  ;;  %2324 = vmatprep.subr.bf16.mxu0 %v2489_v61  ;;  %v2503_v61 = vld [vmem:[%s3049_s4 + $0x130] sm:$0xff]  }
  0x6e   : > { %v706_v57 = vrot.slane %v704_v47, 5  ;;  %v693_v58 = vsel %vm2858_vm12, %v688_v56, %v692_v51  ;;  %v702_v59 = vrot.slane %v701_v28, 4  ;;  %v811_v51 = vld [vmem:[#allocation2 + $0x2c] sm:$0x1]  ;;  %v846_v56 = vshll.u32 %v810_v49, 16 }
  0x6f   : > { %v852_v28 = vshll.u32 %v811_v51, 16 }
  0x70   : > { %2351 = vmatpush3.bf16.msra.mxu1 %v2488_v60  ;;  %2325 = vmatpush3.bf16.msra.mxu0 %v2490_v2  ;;  %v2501_v60 = vld [vmem:[%s3049_s4 + $0x1a8] sm:$0xff]   ;;  %v707_v63 = vsel %vm2858_vm12, %v702_v59, %v706_v57  ;;  %v808_v2 = vld [vmem:[#allocation2 + $0x1c] sm:$0xf]  ;;  %v857_v57 = vshrl.u32 %v812_v52, 16 }
  0x71   : > { %2352 = vmatprep.subr.bf16.mxu1 %v2491_v7  ;;  %2326 = vmatprep.subr.bf16.mxu0 %v2493_v35  ;;  %v2141_v3 = vcombine.low %v693_v58, %v707_v63  ;;  %v818_v7 = vshll.u32 %v806_v0, 16  ;;  %v829_v9 = vshrl.u32 %v808_v2, 16  ;;  %v832_v10 = vshll.u32 %v808_v2, 16  ;;  %v2507_v35 = vld [vmem:[%s3049_s4 + $0x138] sm:$0xff]  }
  0x72   : > { %v848_v63 = vrot.slane %v846_v56, 5  ;;  %v859_v0 = vrot.slane %v857_v57, 4  ;;  %v854_v2 = vrot.slane %v852_v28, 5 }
  0x73   : > { %1727 = vmatmul.mubr.bf16.gmra.mrb[4].mxu1 %v2141_v3  ;;  %v820_v14 = vrot.slane %v818_v7, 5  ;;  %v831_v16 = vrot.slane %v829_v9, 4  ;;  %v834_v17 = vrot.slane %v832_v10, 5  ;;  %v2516_v9 = vld [vmem:[#allocation2 + $0x34] ss:$12 sps:$4 sm:$0xff]  }
  0x74   : > { %2353 = vmatpush3.bf16.msra.mxu1 %v2492_v18  ;;  %2327 = vmatpush3.bf16.msra.mxu0 %v2494_v24  ;;  %v2511_v18 = vld [vmem:[%s3049_s4 + $0x200] sm:$0xff]   ;;  %v2509_v24 = vld [vmem:[%s3049_s4 + $0x1b8] sm:$0xff]   ;;  %v885_v10 = vld [vmem:[#allocation2 + $0x30] sm:$0x8] }
  0x75   : > { %2354 = vmatprep.subr.bf16.mxu1 %v2495_v37  ;;  %2328 = vmatprep.subr.bf16.mxu0 %v2497_v44  ;;  %v821_v19 = vor.u32 %v820_v14, %v817_v13  ;;  %v835_v22 = vor.u32 %v834_v17, %v831_v16  ;;  %v895_v37 = vshrl.u32 %v882_v31, 16  ;;  %v911_v44 = vshll.u32 %v884_v36, 16  ;;  %v887_v13 = vld [vmem:[#allocation2 + $0x3c] sm:$0x8]  ;;  %v888_v14 = vld [vmem:[#allocation2 + $0x40] sm:$0xf] }
  0x76   : > { %1816 = vmatprep.mubr.bf16.mxu1 %v2512_v25  ;;  %v921_v17 = vshrl.u32 %v886_v11, 16 }
  0x77   : > { %v822_v23 = vrot.slane %v821_v19, 4  ;;  %v836_v27 = vrot.slane %v835_v22, 4  ;;  %v897_v47 = vrot.slane %v895_v37, 7  ;;  %v929_v19 = vshrl.u32 %v887_v13, 16  ;;  %v970_v37 = vld [vmem:[#allocation2 + $0x20] sm:$0x1] }
  0x78   : > { %2355 = vmatpush3.bf16.msra.mxu1 %v2496_v43  ;;  %2329 = vmatpush3.bf16.msra.mxu0 %v2499_v48  ;;  %v908_v43 = vshrl.u32 %v884_v36, 16  ;;  %v2153_v48 = vrot.slane %v903_v39, 11  ;;  %v934_v22 = vshrl.u32 %v888_v14, 16  ;;  %v923_v26 = vrot.slane %v921_v17, 7  ;;  %v969_v36 = vld [vmem:[#allocation2 + $0x1c] sm:$0xf] }
  0x79   : > { %2356 = vmatprep.subr.bf16.mxu1 %v2500_v53  ;;  %2330 = vmatprep.subr.bf16.mxu0 %v2502_v55  ;;  %v827_v34 = vsel %vm2858_vm12, %v822_v23, %v826_v20  ;;  %v841_v41 = vsel %vm2858_vm12, %v836_v27, %v840_v21  ;;  %v843_v53 = vshrl.u32 %v810_v49, 16  ;;  %v900_v54 = vor.u32 %v898_v38, %v897_v47  ;;  %v813_v55 = vld [vmem:[#allocation2 + $0x38] sm:$0x1]  ;;  %v2514_v21 = vld [vmem:[#allocation2 + $0x28] ss:$12 sps:$4 sm:$0xff]   ;;  %v2518_v27 = vld [vmem:[%s3049_s4 + $0x220] sm:$0xff]  }
  0x7a   : > { %v2150_v46 = vcombine.low %v827_v34, %v841_v41  ;;  %v910_v50 = vrot.slane %v908_v43, 7  ;;  %v937_v23 = vshll.u32 %v888_v14, 16  ;;  %v2155_v31 = vrot.slane %v929_v19, 11  ;;  %v971_v39 = vld [vmem:[#allocation2 + $0x28] sm:$0xf] }
  0x7b   : > { %v845_v59 = vrot.slane %v843_v53, 4  ;;  %v936_v32 = vrot.slane %v934_v22, 7  ;;  %v972_v41 = vld [vmem:[#allocation2 + $0x2c] sm:$0x1]  ;;  %v981_v43 = vshll.u32 %v969_v36, 16  ;;  %v995_v47 = vshll.u32 %v971_v39, 16 }
  0x7c   : > { %2357 = vmatpush3.bf16.msra.mxu1 %v2501_v60  ;;  %2331 = vmatpush3.bf16.msra.mxu0 %v2503_v61  ;;  %v913_v58 = vor.u32 %v911_v44, %v910_v50  ;;  %v860_v60 = vshll.u32 %v812_v52, 16  ;;  %v866_v61 = vshll.u32 %v813_v55, 16  ;;  %v2519_v50 = vld [vmem:[%s3049_s4 + $0x228] sm:$0xff]   ;;  %v1001_v53 = vshll.u32 %v972_v41, 16 }
  0x7d   : > { %2358 = vmatprep.subr.bf16.mxu1 %v2504_v62  ;;  %2332 = vmatprep.subr.bf16.mxu0 %v2506_v4  ;;  %v901_v62 = vsel %vm2832_vm7, %v2152_v42, %v900_v54  ;;  %v849_v7 = vor.u32 %v848_v63, %v845_v59  ;;  %v939_v34 = vor.u32 %v937_v23, %v936_v32  ;;  %v978_v42 = vshrl.u32 %v969_v36, 16  ;;  %v974_v54 = vld [vmem:[#allocation2 + $0x38] sm:$0x1] }
  0x7e   : > { %1767 = vmatprep.mubr.bf16.mxu0 %v2150_v46  ;;  %v914_v1 = vsel %vm2832_vm7, %v2153_v48, %v913_v58  ;;  %v862_v3 = vrot.slane %v860_v60, 5  ;;  %v868_v4 = vrot.slane %v866_v61, 5  ;;  %v992_v46 = vshrl.u32 %v971_v39, 16  ;;  %v973_v48 = vld [vmem:[#allocation2 + $0x34] sm:$0xf] }
  0x7f   : > { %v2156_v6 = vcombine.low %v901_v62, %v914_v1  ;;  %v940_v44 = vsel %vm2832_vm7, %v2155_v31, %v939_v34  ;;  %v980_v51 = vrot.slane %v978_v42, 4  ;;  %v983_v52 = vrot.slane %v981_v43, 5  ;;  %v976_v60 = vld [vmem:[#allocation2 + $0x44] sm:$0x1] }
  0x80   : > { %2359 = vmatpush3.bf16.msra.mxu1 %v2505_v12  ;;  %2333 = vmatpush3.bf16.msra.mxu0 %v2507_v35  ;;  %v863_v8 = vor.u32 %v862_v3, %v859_v0  ;;  %v2517_v12 = vld [vmem:[%s3049_s4 + $0x218] sm:$0xff]   ;;  %v850_v35 = vrot.slane %v849_v7, 4  ;;  %v994_v56 = vrot.slane %v992_v46, 4  ;;  %v997_v28 = vrot.slane %v995_v47, 5  ;;  %v2520_v3 = vld [vmem:[%s3049_s4 + $0x230] sm:$0xff]  }
  0x81   : > { %2360 = vmatprep.subr.bf16.mxu1 %v2508_v15  ;;  %2384 = vmatprep.subr.bf16.mxu0 %v2511_v18  ;;  %v916_v15 = vshrl.u32 %v885_v10, 16  ;;  %v1006_v57 = vshrl.u32 %v973_v48, 16  ;;  %v984_v58 = vor.u32 %v983_v52, %v980_v51  ;;  %v1003_v59 = vrot.slane %v1001_v53, 5 }
  0x82   : > { %v864_v16 = vrot.slane %v863_v8, 4  ;;  %v855_v20 = vsel %vm2858_vm12, %v850_v35, %v854_v2  ;;  %v1009_v61 = vshll.u32 %v973_v48, 16  ;;  %v1015_v62 = vshll.u32 %v974_v54, 16 }
  0x83   : > { %1768 = vmatmul.mubr.bf16.vlgmr.msra.gmra.mrb[8].mxu0 %v2510_v29  ;;  %v2154_v25 = vrot.slane %v916_v15, 11  ;;  %v998_v63 = vor.u32 %v997_v28, %v994_v56  ;;  %v1008_v0 = vrot.slane %v1006_v57, 4  ;;  %v1020_v1 = vshrl.u32 %v975_v40, 16  ;;  %v2521_v15 = vld [vmem:[%s3049_s4 + $0x238] sm:$0xff]  }
  0x84   : > { %2361 = vmatpush3.bf16.msra.mxu1 %v2509_v24  ;;  %2385 = vmatpush3.bf16.msra.mxu0 %v2511_v18  ;;  %v924_v18 = vshll.u32 %v886_v11, 16  ;;  %v869_v24 = vsel %vm2858_vm12, %v864_v16, %v868_v4  ;;  %v1023_v2 = vshll.u32 %v975_v40, 16  ;;  %v985_v4 = vrot.slane %v984_v58, 4 }
  0x85   : > { %2386 = vmatprep.subr.bf16.mxu0 %v2513_v45  ;;  %v2151_v29 = vcombine.low %v855_v20, %v869_v24  ;;  %v999_v7 = vrot.slane %v998_v63, 4  ;;  %v1022_v8 = vrot.slane %v1020_v1, 4  ;;  %v1017_v35 = vrot.slane %v1015_v62, 5 }
  0x86   : > { %v926_v33 = vor.u32 %v924_v18, %v923_v26 }
  0x87   : > { %1817 = vmatmul.mubr.bf16.vlgmr.msra.gmra.mrb[8].mxu1 %v2156_v6  ;;  %1775 = vmatprep.mubr.bf16.mxu0 %v2151_v29  ;;  %v1029_v6 = vshll.u32 %v976_v60, 16 }
  0x88   : > { %2387 = vmatpush3.bf16.msra.mxu0 %v2513_v45  ;;  %1824 = vmatprep.mubr.bf16.mxu1 %v2516_v9  ;;  %v927_v38 = vsel %vm2832_vm7, %v2154_v25, %v926_v33  ;;  %v987_v45 = vshll.u32 %v970_v37, 16  ;;  %v1025_v9 = vrot.slane %v1023_v2, 5 }
  0x89   : > { %2388 = vmatprep.subr.bf16.mxu0 %v2515_v5  ;;  %v2157_v49 = vcombine.low %v927_v38, %v940_v44  ;;  %v1031_v14 = vrot.slane %v1029_v6, 5 }
  0x8a   : > { %v989_v55 = vrot.slane %v987_v45, 5  ;;  %v1026_v13 = vor.u32 %v1025_v9, %v1022_v8 }
  0x8b   : > { %1776 = vmatmul.mubr.bf16.gmra.mrb[12].mxu0 %v2514_v21 }
  0x8c   : > { %2389 = vmatpush3.bf16.msra.mxu0 %v2515_v5  ;;  %v1011_v5 = vrot.slane %v1009_v61, 5  ;;  %v990_v10 = vsel %vm2858_vm12, %v985_v4, %v989_v55  ;;  %v1027_v18 = vrot.slane %v1026_v13, 4 }
  0x8d   : > { %2390 = vmatprep.subr.bf16.mxu0 %v2517_v12 }
  0x8e   : > { %v1012_v11 = vor.u32 %v1011_v5, %v1008_v0  ;;  %v1032_v20 = vsel %vm2858_vm12, %v1027_v18, %v1031_v14 }
  0x8f   : > { %1825 = vmatmul.mubr.bf16.gmra.mrb[12].mxu1 %v2157_v49 }
  0x90   : > { %2391 = vmatpush3.bf16.msra.mxu0 %v2517_v12  ;;  %v1004_v12 = vsel %vm2858_vm12, %v999_v7, %v1003_v59  ;;  %v1013_v17 = vrot.slane %v1012_v11, 4 }
  0x91   : > { %2392 = vmatprep.subr.bf16.mxu0 %v2518_v27  ;;  %v2160_v16 = vcombine.low %v990_v10, %v1004_v12 }
  0x92   : > { %v1018_v19 = vsel %vm2858_vm12, %v1013_v17, %v1017_v35 }
  0x93   : > { %2400 = vmatprep.mubr.bf16.mxu0 %v2160_v16  ;;  %v2161_v21 = vcombine.low %v1018_v19, %v1032_v20 }
  0x94   : > { %2393 = vmatpush3.bf16.msra.mxu0 %v2518_v27 }
  0x95   : > { %2394 = vmatprep.subr.bf16.mxu0 %v2519_v50 }
  0x98   : > { %2395 = vmatpush3.bf16.msra.mxu0 %v2519_v50 }
  0x99   : > { %2396 = vmatprep.subr.bf16.mxu0 %v2520_v3 }
  0x9c   : > { %2397 = vmatpush3.bf16.msra.mxu0 %v2520_v3 }
  0x9d   : > { %2398 = vmatprep.subr.bf16.mxu0 %v2521_v15 }
  0xa0   : > { %2399 = vmatpush3.bf16.msra.mxu0 %v2521_v15 }
  0xa3   : > { %2401 = vmatmul.mubr.bf16.vlgmr.msra.gmra.mrb[16].mxu0 %v2161_v21 }
 0x136   : > { %v2278_v22 = vpop.f32.mrb[0].mxu0 }
 0x137   : > { %v2279_v23 = vpop.f32.mrb[1].mxu0 }
 0x138   : > { %v2280_v24 = vadd.f32 %v2279_v23, %v2278_v22  ;;  %v2281_v25 = vpop.f32.mrb[2].mxu0 }
 0x139   : > { %v2282_v27 = vpop.f32.mrb[3].mxu0 }
 0x13a   : > { %v2306_v26 = vpop.f32.mrb[0].mxu1  ;;  %v2283_v31 = vadd.f32 %v2282_v27, %v2281_v25 }
 0x13b   : > { %v2307_v29 = vpop.f32.mrb[1].mxu1 }
 0x13c   : > { %v2308_v32 = vadd.f32 %v2307_v29, %v2306_v26  ;;  %v2309_v33 = vpop.f32.mrb[2].mxu1 }
 0x13d   : > { %v2310_v34 = vpop.f32.mrb[3].mxu1 }
 0x13e   : > { %v1721_v36 = vadd.f32 %v2308_v32, %v2280_v24  ;;  %v2311_v37 = vadd.f32 %v2310_v34, %v2309_v33  ;;  %v2284_v30 = vpop.f32.mrb[4].mxu0 }
 0x13f   : > { %v2285_v39 = vpop.f32.mrb[5].mxu0 }
 0x140   : > { %v1724_v38 = vadd.f32 %v2311_v37, %v2283_v31  ;;  %v2286_v41 = vadd.f32 %v2285_v39, %v2284_v30  ;;  %v2287_v42 = vpop.f32.mrb[6].mxu0 }
 0x141   : > { %v2288_v43 = vpop.f32.mrb[7].mxu0 }
 0x142   : > { %v2289_v44 = vadd.f32 %v2288_v43, %v2287_v42 }
 0x146   : > { %v2312_v45 = vpop.f32.mrb[4].mxu1 }
 0x147   : > { %v2313_v46 = vpop.f32.mrb[5].mxu1 }
 0x148   : > { %v2314_v47 = vadd.f32 %v2313_v46, %v2312_v45  ;;  %v2315_v48 = vpop.f32.mrb[6].mxu1 }
 0x149   : > { %v2316_v49 = vpop.f32.mrb[7].mxu1 }
 0x14a   : > { %v1729_v50 = vadd.f32 %v2314_v47, %v2286_v41  ;;  %v2317_v51 = vadd.f32 %v2316_v49, %v2315_v48 }
 0x14c   : > { %v1732_v52 = vadd.f32 %v2317_v51, %v2289_v44 }
 0x156   : > { %v2334_v53 = vpop.f32.mrb[8].mxu0 }
 0x157   : > { %v2335_v54 = vpop.f32.mrb[9].mxu0 }
 0x158   : > { %v2336_v55 = vadd.f32 %v2335_v54, %v2334_v53  ;;  %v2337_v56 = vpop.f32.mrb[10].mxu0 }
 0x159   : > { %v2338_v28 = vpop.f32.mrb[11].mxu0 }
 0x15a   : > { %v1770_v40 = vadd.f32 %v2336_v55, %v1721_v36  ;;  %v2339_v57 = vadd.f32 %v2338_v28, %v2337_v56  ;;  %v2362_v58 = vpop.f32.mrb[8].mxu1 }
 0x15b   : > { %v2363_v60 = vpop.f32.mrb[9].mxu1 }
 0x15c   : > { %v1773_v59 = vadd.f32 %v2339_v57, %v1724_v38  ;;  %v2364_v61 = vadd.f32 %v2363_v60, %v2362_v58  ;;  %v2365_v62 = vpop.f32.mrb[10].mxu1 }
 0x15d   : > { %v2366_v63 = vpop.f32.mrb[11].mxu1 }
 0x15e   : > { %v2367_v0 = vadd.f32 %v2366_v63, %v2365_v62  ;;  %v1819_v1 = vadd.f32 %v2364_v61, %v1770_v40  ;;  %v2340_v3 = vpop.f32.mrb[12].mxu0 }
 0x15f   : > { %v2341_v4 = vpop.f32.mrb[13].mxu0 }
 0x160   : > { %v1822_v2 = vadd.f32 %v2367_v0, %v1773_v59  ;;  %v2342_v5 = vadd.f32 %v2341_v4, %v2340_v3  ;;  %v2343_v6 = vpop.f32.mrb[14].mxu0 }
 0x161   : > { %v2344_v7 = vpop.f32.mrb[15].mxu0 }
 0x162   : > { %v1778_v8 = vadd.f32 %v2342_v5, %v1729_v50  ;;  %v2368_v9 = vpop.f32.mrb[12].mxu1  ;;  %v2345_v10 = vadd.f32 %v2344_v7, %v2343_v6 }
 0x163   : > { %v2369_v11 = vpop.f32.mrb[13].mxu1 }
 0x164   : > { %v1781_v12 = vadd.f32 %v2345_v10, %v1732_v52  ;;  %v2370_v35 = vadd.f32 %v2369_v11, %v2368_v9  ;;  %v2371_v13 = vpop.f32.mrb[14].mxu1 }
 0x165   : > { %v2372_v14 = vpop.f32.mrb[15].mxu1 }
 0x166   : > { %v2373_v15 = vadd.f32 %v2372_v14, %v2371_v13  ;;  %v1827_v16 = vadd.f32 %v2370_v35, %v1778_v8 }
 0x168   : > { %v1830_v17 = vadd.f32 %v2373_v15, %v1781_v12 }
 0x176   : > { %v2402_v18 = vpop.f32.mrb[16].mxu0 }
 0x177   : > { %v1876_v19 = vadd.f32 %v2402_v18, %v1827_v16  ;;  %v1867_v20 = vpop.f32.mrb[17].mxu0 }
 0x178   : > { %v1868_v21 = vadd.f32 %v1867_v20, %v1819_v1  ;;  %v2403_v22 = vpop.f32.mrb[18].mxu0 }
 0x179   : > { %v1879_v23 = vadd.f32 %v2403_v22, %v1830_v17  ;;  %v1870_v24 = vpop.f32.mrb[19].mxu0  ;;  %v1901_v33 = vmul.f32 %v1876_v19, %v1876_v19 }
 0x17a   : > { %v1871_v25 = vadd.f32 %v1870_v24, %v1822_v2  ;;  %v1899_v27 = vmul.f32 %v1868_v21, %v1868_v21 }
 0x17b   : > { %v2258_v26 = vpack.c.bf16 %v1879_v23, %v1876_v19  ;;  %v1902_v37 = vmul.f32 %v1879_v23, %v1879_v23 }
 0x17c   : > { %v2253_v29 = vpack.c.bf16 %v1871_v25, %v1868_v21  ;;  %v1890_v31 = vadd.f32 %v1871_v25, %v1868_v21  ;;  %v1900_v32 = vmul.f32 %v1871_v25, %v1871_v25 }
 0x17d   : > { %2261 = vst [vmem:[%s2653_s22 + $0x8] sm:$0xff] %v2258_v26  }
 0x17e   : > { %2254 = vst [vmem:[%s2653_s22] sm:$0xff] %v2253_v29   ;;  %v1891_v34 = vadd.f32 %v1890_v31, %v1876_v19  ;;  %v1903_v36 = vadd.f32 %v1900_v32, %v1899_v27 }
 0x180   : > { %v1892_v38 = vadd.f32 %v1891_v34, %v1879_v23  ;;  %v1904_v30 = vadd.f32 %v1903_v36, %v1901_v33 }
 0x182   : > { %v1893_v39 = vrot.slane %v1892_v38, 4  ;;  %v1905_v41 = vadd.f32 %v1904_v30, %v1902_v37 }
 0x184   : > { %v1894_v42 = vadd.f32 %v1893_v39, %v1892_v38  ;;  %v1906_v43 = vrot.slane %v1905_v41, 4 }
 0x186   : > { %v1895_v44 = vrot.slane %v1894_v42, 2  ;;  %v1907_v45 = vadd.f32 %v1906_v43, %v1905_v41 }
 0x188   : > { %v1896_v46 = vadd.f32 %v1895_v44, %v1894_v42  ;;  %v1908_v47 = vrot.slane %v1907_v45, 2 }
 0x18a   : > { %v1897_v48 = vrot.slane %v1896_v46, 1  ;;  %v1909_v49 = vadd.f32 %v1908_v47, %v1907_v45 }
 0x18c   : > { %v1898_v50 = vadd.f32 %v1897_v48, %v1896_v46  ;;  %v1910_v51 = vrot.slane %v1909_v49, 1 }
 0x18e   : > { %v1911_v52 = vadd.f32 %v1910_v51, %v1909_v49  ;;  %1912 = vst [vmem:[%s3067_s11] sm:$0x1] %v1898_v50 }
 0x190   : > { %1913 = vst [vmem:[%s326_s17] sm:$0x1] %v1911_v52 }
 0x191 PF: > { %s18_s28 = sadd.s32 1, %s2564_s28   ;;  %s3068_s24 = smov %s2556_s26 }
 0x192   : > { %p15_p12 = scmp.ge.s32.totalorder %s18_s28, 6   ;;  %s3069_s25 = smov %s2560_s27 }
 0x193   : > { %s3070_s26 = smov %s3073_s29  ;;  %s3071_s27 = smov %s3077_s30 }
 0x194   :  { %17 = sbr.rel (!%p15_p12) target bundleno = 4 (0x4), region = 178 }
 0x19b   :  { %1980 = vsyncmov [#allocation5] }
 0x19e   :  { %s1981_s13 = vpop.sfrf %1980 }
 0x19f   :  { %p2236_p13 = scmp.ne.s32.totalorder %s1981_s13, 0 }
 0x1a1   :  { %1985 = shalt.err (%p2236_p13)  }
 0x1a2   :  { %1987 = vsyncmov [#allocation5 + $0x1] }
 0x1a5   :  { %s1988_s17 = vpop.sfrf %1987 }
 0x1a6   :  { %p2237_p0 = scmp.ne.s32.totalorder %s1988_s17, 0 }
 0x1a8   :  { %1992 = shalt.err (%p2237_p0)  }

</bundles_post_ra>
